<compile_context>
chip_gen: v6e
topology: v6e:2x2x1
jax: 0.10.0
libtpu: 0.0.40
codegen_flags: <defaults>
</compile_context>

<pallas_src>
import numpy as np
import jax
import jax.numpy as jnp
from jax import lax
from jax.experimental import pallas as pl
from jax.experimental.pallas import tpu as pltpu


def construct_magic_rescale_const(time_length_to_use):
    return 400.0 / (750.0 - 500.0 + time_length_to_use)


MAGIC_LOSS_RESCALE_CONST2 = construct_magic_rescale_const(500.0)


def _round_up(x, m):
    return ((x + m - 1) // m) * m


def _pad_last(x, target):
    pad = target - x.shape[-1]
    if pad == 0:
        return x
    return jnp.pad(x, [(0, 0)] * (x.ndim - 1) + [(0, pad)])


# ----------------------------------------------------------------------------
# JAX "glue" reproducing the module's precompute_* methods and buffer setup.
# ----------------------------------------------------------------------------
def precompute_feedback_gensig(feedback_filters, bias, observed_spikes):
    """precompute_gensig_components: grouped valid cross-correlation + bias."""
    n_cells, n_bins_filter = feedback_filters.shape
    n_bins = observed_spikes.shape[-1]
    l_out = n_bins - n_bins_filter + 1
    acc = jnp.zeros(observed_spikes.shape[:1] + (n_cells, l_out), jnp.float32)
    for k in range(n_bins_filter):
        acc = acc + observed_spikes[:, :, k:k + l_out] * feedback_filters[None, :, k:k + 1]
    return acc + bias[None, :, :]


def precompute_history(spat_flat, history_frames):
    """precompute_history_frames: apply flat spatial filters to history frames."""
    b, n_hist, h, w = history_frames.shape
    hf = history_frames.reshape(b, n_hist, h * w)
    return jnp.einsum('cp,bfp->bfc', spat_flat, hf)


def make_forward_sel_weights(batch, n_bins, n_frames_total):
    """Synthetic stand-in for batch_compute_interval_overlaps."""
    t = np.linspace(0.0, n_frames_total - 1.0, n_bins)
    lo = np.minimum(np.floor(t).astype(np.int32), n_frames_total - 2)
    frac = (t - lo).astype(np.float32)
    sel = np.stack([lo, lo + 1], axis=-1)
    w = np.stack([1.0 - frac, frac], axis=-1).astype(np.float32)
    sel = np.broadcast_to(sel, (batch, n_bins, 2)).copy()
    w = np.broadcast_to(w, (batch, n_bins, 2)).copy()
    return jnp.asarray(sel), jnp.asarray(w)


def dense_upsample_matrix(forward_sel, forward_weights, n_frames_total):
    """Densify (sel, weights): W[b, t, f] = sum_k w[b,t,k] * [sel[b,t,k] == f]."""
    onehot = jax.nn.one_hot(forward_sel, n_frames_total, dtype=forward_weights.dtype)
    return jnp.sum(onehot * forward_weights[..., None], axis=2)            # (B, n_bins, n_ft)


def jitter_frames(batched_image, eye_movements):
    """JitterFrame.apply stand-in: per-frame integer translation of the image."""
    # TODO(synk): JitterFrame.apply source not provided; implemented as circular
    # integer shift (jnp.roll) along (H, W) per frame.
    def one(img, em):
        return jnp.roll(jnp.roll(img, em[0], axis=0), em[1], axis=1)

    return jax.vmap(lambda img, ems: jax.vmap(lambda e: one(img, e))(ems))(
        batched_image, eye_movements)


# ----------------------------------------------------------------------------
# Pallas kernel + wrapper.
# ----------------------------------------------------------------------------
def fb_only_known_eye_movement_image_loss(
        spat_flat, timecourse, hist_spat, fb_gensig, w_dense,
        batched_image, batched_spikes, eye_movements, time_mask,
        magic_rescale_constant=MAGIC_LOSS_RESCALE_CONST2, tb=None):
    b, _, _ = batched_image.shape
    n_cells, n_pixels = spat_flat.shape
    n_bins_filter = timecourse.shape[1]
    n_bins = batched_spikes.shape[2]
    n_hist = hist_spat.shape[1]
    n_jf = eye_movements.shape[1]
    l_out = n_bins - n_bins_filter + 1
    l_loss = l_out - 1
    # NOTE: torch docstring claims time_mask has length n_bins - n_bins_filter + 1,
    # but broadcasting against gen_sig[:, :, :-1] requires n_bins - n_bins_filter.
    assert time_mask.shape == (b, l_loss)

    # Batch tile: keep >= 2 grid steps whenever b >= 2 (megacore / pipeline overlap).
    if tb is None:
        cands = [t for t in range(1, min(b, 8) + 1) if b % t == 0 and (b // t) >= 2]
        tb = max(cands) if cands else b
    assert b % tb == 0
    n_blocks = b // tb

    # Padded sizes: lane-dense loss window, 8-aligned jittered-frame rows.
    l_pad = _round_up(l_loss, 128)
    nj_pad = _round_up(max(n_jf, 1), 8)
    n_bins_pad = _round_up(max(n_bins, l_pad + n_bins_filter - 1), 128)
    rows = tb * nj_pad

    # ---- wrapper-side precompute / operand layout -------------------------
    # Jittered frames, padded per element to nj_pad rows, grouped per grid block.
    jit = jitter_frames(batched_image, eye_movements).reshape(b, n_jf, n_pixels)
    if nj_pad != n_jf:
        jit = jnp.pad(jit, ((0, 0), (0, nj_pad - n_jf), (0, 0)))
    jit3d = jit.reshape(n_blocks, rows, n_pixels).astype(jnp.bfloat16)

    # Jittered-frame part of the dense upsample operator, (B, nj_pad, n_bins_pad).
    w_jit = jnp.transpose(w_dense[:, :, n_hist:], (0, 2, 1))
    w_jit = jnp.pad(w_jit, ((0, 0), (0, nj_pad - n_jf), (0, n_bins_pad - n_bins)))
    w_jit = w_jit.astype(jnp.bfloat16)

    # History frames + feedback gensig + bias fold into a forward-invariant base.
    ups_hist = jnp.einsum('bfc,btf->bct', hist_spat, w_dense[:, :, :n_hist])
    hist_contrib = jnp.zeros((b, n_cells, l_loss), jnp.float32)
    for k in range(n_bins_filter):
        hist_contrib = hist_contrib + ups_hist[:, :, k:k + l_loss] * timecourse[None, :, k:k + 1]
    base = _pad_last(fb_gensig[:, :, :l_loss] + hist_contrib, l_pad).astype(jnp.float32)

    # Pre-sliced spikes (0/1 -> bf16 is exact) and mask*magic (zero in padded lanes).
    spk = _pad_last(batched_spikes[:, :, n_bins_filter:], l_pad).astype(jnp.bfloat16)
    maskm = _pad_last((time_mask * magic_rescale_constant).reshape(b, 1, l_loss),
                      l_pad).astype(jnp.float32)

    spat_bf = spat_flat.astype(jnp.bfloat16)
    tc_f32 = timecourse.astype(jnp.float32)

    # Explicit scoped-VMEM budget: 2x (double-buffered) per-step blocks + margin.
    block_bytes = (n_cells * n_pixels * 2          # spat (bf16)
                   + rows * n_pixels * 2           # jittered frames (bf16)
                   + tb * nj_pad * n_bins_pad * 2  # w_jit (bf16)
                   + n_cells * n_bins_filter * 4   # timecourse (f32)
                   + tb * n_cells * l_pad * 4      # base (f32)
                   + tb * n_cells * l_pad * 2      # spikes (bf16)
                   + tb * l_pad * 4                # mask (f32)
                   + tb * l_pad * 4)               # output (f32)
    vmem_limit = int(min(100 << 20, max(2 * block_bytes + (4 << 20), 8 << 20)))

    def kernel(spat_ref, jit_ref, wjit_ref, tc_ref, base_ref, spk_ref, mask_ref, out_ref):
        # MXU dot 1: (n_cells, n_pixels) x (rows, n_pixels)^T -> (n_cells, rows).
        # TODO(synk): at realistic n_pixels add a K(pixel) grid axis ('arbitrary',
        # last) with an f32 accumulator scratch and tile n_cells.
        jit_spat = lax.dot_general(spat_ref[...], jit_ref[0],
                                   (((1,), (1,)), ((), ())),
                                   preferred_element_type=jnp.float32)
        for bb in range(tb):                               # static, tb <= 8
            js_b = jit_spat[:, bb * nj_pad:(bb + 1) * nj_pad].astype(jnp.bfloat16)
            # MXU dot 2: (n_cells, nj_pad) x (nj_pad, n_bins_pad) -> time-upsampled drive.
            ups = lax.dot_general(js_b, wjit_ref[bb],
                                  (((1,), (0,)), ((), ())),
                                  preferred_element_type=jnp.float32)
            # Depthwise timecourse conv as K shifted FMAs reusing the resident ups.
            gen = base_ref[bb]                             # (n_cells, l_pad), f32
            for k in range(n_bins_filter):
                gen = gen + ups[:, k:k + l_pad] * tc_ref[:, k:k + 1]
            s = spk_ref[bb].astype(jnp.float32)
            # TODO(synk): spiking_loss_fn is a constructor argument; Poisson NLL
            # with exponential nonlinearity exp(g) - s*g assumed (standard GLM loss).
            loss = jnp.exp(gen) - s * gen
            masked = loss * mask_ref[bb]                   # (1, l_pad) broadcast, 0 in pad lanes
            out_ref[bb] = jnp.sum(masked, axis=0, keepdims=True)   # lane-dense partial sum

    out = pl.pallas_call(
        kernel,
        out_shape=jax.ShapeDtypeStruct((b, 1, l_pad), jnp.float32),
        grid=(n_blocks,),
        in_specs=[
            # Invariant weights (constant index_map).  TODO(synk): on v7x consider
            # pipeline_mode=pl.Buffered(1) for spat to save one VMEM copy.
            pl.BlockSpec((n_cells, n_pixels), lambda i: (0, 0)),
            pl.BlockSpec((1, rows, n_pixels), lambda i: (i, 0, 0)),
            pl.BlockSpec((tb, nj_pad, n_bins_pad), lambda i: (i, 0, 0)),
            pl.BlockSpec((n_cells, n_bins_filter), lambda i: (0, 0)),
            pl.BlockSpec((tb, n_cells, l_pad), lambda i: (i, 0, 0)),
            pl.BlockSpec((tb, n_cells, l_pad), lambda i: (i, 0, 0)),
            pl.BlockSpec((tb, 1, l_pad), lambda i: (i, 0, 0)),
        ],
        out_specs=pl.BlockSpec((tb, 1, l_pad), lambda i: (i, 0, 0)),
        compiler_params=pltpu.CompilerParams(
            dimension_semantics=("parallel",),
            vmem_limit_bytes=vmem_limit),
    )(spat_bf, jit3d, w_jit, tc_f32, base, spk, maskm)

    # Finish the time reduction in the wrapper (padded lanes are exactly zero).
    return jnp.sum(out[:, 0, :], axis=-1)


# ----------------------------------------------------------------------------
# Pure-JAX f32 reference (unfolded path, for correctness check).
# ----------------------------------------------------------------------------
def reference_forward(spat_flat, timecourse, hist_spat, fb_gensig, w_dense,
                      batched_image, batched_spikes, eye_movements, time_mask,
                      magic_rescale_constant=MAGIC_LOSS_RESCALE_CONST2):
    b = batched_image.shape[0]
    n_cells, n_pixels = spat_flat.shape
    n_bins_filter = timecourse.shape[1]
    n_bins = batched_spikes.shape[2]
    l_out = n_bins - n_bins_filter + 1
    jit_flat = jitter_frames(batched_image, eye_movements).reshape(b, -1, n_pixels)
    jit_spat = jnp.einsum('bfp,cp->bfc', jit_flat, spat_flat)
    frames = jnp.concatenate([hist_spat, jit_spat], axis=1)
    ups = jnp.einsum('btf,bfc->bct', w_dense, frames)
    acc = jnp.zeros((b, n_cells, l_out), jnp.float32)
    for k in range(n_bins_filter):
        acc = acc + ups[:, :, k:k + l_out] * timecourse[None, :, k:k + 1]
    gen = acc + fb_gensig
    g = gen[:, :, :-1]
    s = batched_spikes[:, :, n_bins_filter:]
    loss = jnp.exp(g) - s * g
    masked = loss * time_mask[:, None, :]
    return jnp.sum(masked * magic_rescale_constant, axis=(1, 2))


if __name__ == "__main__":
    B = 4
    N_CELLS = 16
    H = W = 8
    N_PIXELS = H * W
    N_BINS_FILTER = 8
    N_BINS = 40
    N_HIST = 2
    N_JF = 4                      # jittered frames (== n_frames - n_history_frames)
    N_FT = N_HIST + N_JF
    L_OUT = N_BINS - N_BINS_FILTER + 1
    L_LOSS = L_OUT - 1

    key = jax.random.PRNGKey(0)
    keys = jax.random.split(key, 10)

    # deterministic synthetic model parameters (shapes from the module __init__)
    spat_flat = jax.random.normal(keys[0], (N_CELLS, N_PIXELS), jnp.float32) * 0.05
    timecourse = jax.random.normal(keys[1], (N_CELLS, N_BINS_FILTER), jnp.float32) * 0.1
    feedback = jax.random.normal(keys[2], (N_CELLS, N_BINS_FILTER), jnp.float32) * 0.05
    bias = jax.random.normal(keys[3], (N_CELLS, 1), jnp.float32) * 0.1

    # forward() inputs
    batched_image = jax.random.normal(keys[4], (B, H, W), jnp.float32)
    batched_spikes = jax.random.bernoulli(keys[5], 0.3, (B, N_CELLS, N_BINS)).astype(jnp.float32)
    eye_movements = jax.random.randint(keys[6], (B, N_JF, 2), -2, 3, dtype=jnp.int32)
    time_mask = (jax.random.uniform(keys[7], (B, L_LOSS)) > 0.2).astype(jnp.float32)
    history_frames = jax.random.normal(keys[8], (B, N_HIST, H, W), jnp.float32)

    # module precompute_* methods (JAX glue)
    fb_gensig = precompute_feedback_gensig(feedback, bias, batched_spikes)   # (B, n_cells, L_OUT)
    hist_spat = precompute_history(spat_flat, history_frames)                # (B, n_hist, n_cells)

    # batch_compute_interval_overlaps stand-in -> dense upsampling matrix
    fwd_sel, fwd_w = make_forward_sel_weights(B, N_BINS, N_FT)
    w_dense = dense_upsample_matrix(fwd_sel, fwd_w, N_FT)                    # (B, n_bins, n_ft)

    out = fb_only_known_eye_movement_image_loss(
        spat_flat, timecourse, hist_spat, fb_gensig, w_dense,
        batched_image, batched_spikes, eye_movements, time_mask)
    out = jax.block_until_ready(out)

    ref = reference_forward(
        spat_flat, timecourse, hist_spat, fb_gensig, w_dense,
        batched_image, batched_spikes, eye_movements, time_mask)
    ref = jax.block_until_ready(ref)

    # bf16 streamed operands in the kernel vs f32 reference -> ~1e-3 relative error.
    np.testing.assert_allclose(np.asarray(out), np.asarray(ref), rtol=1e-2, atol=1e-2)
    print("KERNEL_OK")
</pallas_src>

<mosaic_0001>
module attributes {stable_mosaic.version = 11 : i64} {
  func.func @kernel(%arg0: i32, %arg1: memref<16x64xbf16, #tpu.memory_space<vmem>>, %arg2: memref<1x16x64xbf16, #tpu.memory_space<vmem>>, %arg3: memref<2x8x256xbf16, #tpu.memory_space<vmem>>, %arg4: memref<16x8xf32, #tpu.memory_space<vmem>>, %arg5: memref<2x16x128xf32, #tpu.memory_space<vmem>>, %arg6: memref<2x16x128xbf16, #tpu.memory_space<vmem>>, %arg7: memref<2x1x128xf32, #tpu.memory_space<vmem>>, %arg8: memref<2x1x128xf32, #tpu.memory_space<vmem>>) attributes {dimension_semantics = [#tpu.dimension_semantics<parallel>], iteration_bounds = array<i64: 2>, scalar_prefetch = 0 : i64, scratch_operands = 0 : i64, tpu.core_type = #tpu.core_type<tc>, window_params = [{pipeline_mode = #tpu.pipeline_mode<synchronous>, transform_indices = @transform_0, window_bounds = array<i64: 16, 64>}, {transform_indices = @transform_1, window_bounds = array<i64: 1, 16, 64>}, {transform_indices = @transform_2, window_bounds = array<i64: 2, 8, 256>}, {pipeline_mode = #tpu.pipeline_mode<synchronous>, transform_indices = @transform_3, window_bounds = array<i64: 16, 8>}, {transform_indices = @transform_4, window_bounds = array<i64: 2, 16, 128>}, {transform_indices = @transform_5, window_bounds = array<i64: 2, 16, 128>}, {transform_indices = @transform_6, window_bounds = array<i64: 2, 1, 128>}, {transform_indices = @transform_7, window_bounds = array<i64: 2, 1, 128>}]} {
    %c0 = arith.constant 0 : index
    %c0_0 = arith.constant 0 : index
    %0 = vector.load %arg1[%c0, %c0_0] : memref<16x64xbf16, #tpu.memory_space<vmem>>, vector<16x64xbf16>
    %c0_1 = arith.constant 0 : index
    %c0_2 = arith.constant 0 : index
    %c0_3 = arith.constant 0 : index
    %1 = vector.load %arg2[%c0_1, %c0_2, %c0_3] : memref<1x16x64xbf16, #tpu.memory_space<vmem>>, vector<1x16x64xbf16>
    %2 = vector.shape_cast %1 : vector<1x16x64xbf16> to vector<16x64xbf16>
    %cst = arith.constant dense<0.000000e+00> : vector<16x16xf32>
    %3 = tpu.matmul %0, %2, %cst {dimension_numbers = #tpu.dot_dimension_numbers<[1], [1], [0], [0], [0, 0, 1, 0], [], []>} : vector<16x64xbf16>, vector<16x64xbf16>, vector<16x16xf32> -> vector<16x16xf32>
    %4 = vector.extract_strided_slice %3 {offsets = [0, 0], sizes = [16, 8], strides = [1, 1]} : vector<16x16xf32> to vector<16x8xf32>
    %5 = arith.truncf %4 : vector<16x8xf32> to vector<16x8xbf16>
    %c0_4 = arith.constant 0 : index
    %c0_5 = arith.constant 0 : index
    %c0_6 = arith.constant 0 : index
    %6 = vector.load %arg3[%c0_4, %c0_5, %c0_6] : memref<2x8x256xbf16, #tpu.memory_space<vmem>>, vector<1x8x256xbf16>
    %7 = vector.shape_cast %6 : vector<1x8x256xbf16> to vector<8x256xbf16>
    %cst_7 = arith.constant dense<0.000000e+00> : vector<16x256xf32>
    %8 = tpu.matmul %5, %7, %cst_7 {dimension_numbers = #tpu.dot_dimension_numbers<[1], [0], [0], [1], [0, 0, 1, 1], [], []>} : vector<16x8xbf16>, vector<8x256xbf16>, vector<16x256xf32> -> vector<16x256xf32>
    %c0_8 = arith.constant 0 : index
    %c0_9 = arith.constant 0 : index
    %c0_10 = arith.constant 0 : index
    %9 = vector.load %arg5[%c0_8, %c0_9, %c0_10] : memref<2x16x128xf32, #tpu.memory_space<vmem>>, vector<1x16x128xf32>
    %10 = vector.shape_cast %9 : vector<1x16x128xf32> to vector<16x128xf32>
    %11 = vector.extract_strided_slice %8 {offsets = [0, 0], sizes = [16, 128], strides = [1, 1]} : vector<16x256xf32> to vector<16x128xf32>
    %c0_11 = arith.constant 0 : index
    %c0_12 = arith.constant 0 : index
    %12 = vector.load %arg4[%c0_11, %c0_12] : memref<16x8xf32, #tpu.memory_space<vmem>>, vector<16x1xf32>
    %13 = vector.broadcast %12 : vector<16x1xf32> to vector<16x128xf32>
    %14 = arith.mulf %11, %13 : vector<16x128xf32>
    %15 = arith.addf %10, %14 : vector<16x128xf32>
    %16 = vector.extract_strided_slice %8 {offsets = [0, 1], sizes = [16, 128], strides = [1, 1]} : vector<16x256xf32> to vector<16x128xf32>
    %c0_13 = arith.constant 0 : index
    %c1 = arith.constant 1 : index
    %17 = vector.load %arg4[%c0_13, %c1] : memref<16x8xf32, #tpu.memory_space<vmem>>, vector<16x1xf32>
    %18 = vector.broadcast %17 : vector<16x1xf32> to vector<16x128xf32>
    %19 = arith.mulf %16, %18 : vector<16x128xf32>
    %20 = arith.addf %15, %19 : vector<16x128xf32>
    %21 = vector.extract_strided_slice %8 {offsets = [0, 2], sizes = [16, 128], strides = [1, 1]} : vector<16x256xf32> to vector<16x128xf32>
    %c0_14 = arith.constant 0 : index
    %c2 = arith.constant 2 : index
    %22 = vector.load %arg4[%c0_14, %c2] : memref<16x8xf32, #tpu.memory_space<vmem>>, vector<16x1xf32>
    %23 = vector.broadcast %22 : vector<16x1xf32> to vector<16x128xf32>
    %24 = arith.mulf %21, %23 : vector<16x128xf32>
    %25 = arith.addf %20, %24 : vector<16x128xf32>
    %26 = vector.extract_strided_slice %8 {offsets = [0, 3], sizes = [16, 128], strides = [1, 1]} : vector<16x256xf32> to vector<16x128xf32>
    %c0_15 = arith.constant 0 : index
    %c3 = arith.constant 3 : index
    %27 = vector.load %arg4[%c0_15, %c3] : memref<16x8xf32, #tpu.memory_space<vmem>>, vector<16x1xf32>
    %28 = vector.broadcast %27 : vector<16x1xf32> to vector<16x128xf32>
    %29 = arith.mulf %26, %28 : vector<16x128xf32>
    %30 = arith.addf %25, %29 : vector<16x128xf32>
    %31 = vector.extract_strided_slice %8 {offsets = [0, 4], sizes = [16, 128], strides = [1, 1]} : vector<16x256xf32> to vector<16x128xf32>
    %c0_16 = arith.constant 0 : index
    %c4 = arith.constant 4 : index
    %32 = vector.load %arg4[%c0_16, %c4] : memref<16x8xf32, #tpu.memory_space<vmem>>, vector<16x1xf32>
    %33 = vector.broadcast %32 : vector<16x1xf32> to vector<16x128xf32>
    %34 = arith.mulf %31, %33 : vector<16x128xf32>
    %35 = arith.addf %30, %34 : vector<16x128xf32>
    %36 = vector.extract_strided_slice %8 {offsets = [0, 5], sizes = [16, 128], strides = [1, 1]} : vector<16x256xf32> to vector<16x128xf32>
    %c0_17 = arith.constant 0 : index
    %c5 = arith.constant 5 : index
    %37 = vector.load %arg4[%c0_17, %c5] : memref<16x8xf32, #tpu.memory_space<vmem>>, vector<16x1xf32>
    %38 = vector.broadcast %37 : vector<16x1xf32> to vector<16x128xf32>
    %39 = arith.mulf %36, %38 : vector<16x128xf32>
    %40 = arith.addf %35, %39 : vector<16x128xf32>
    %41 = vector.extract_strided_slice %8 {offsets = [0, 6], sizes = [16, 128], strides = [1, 1]} : vector<16x256xf32> to vector<16x128xf32>
    %c0_18 = arith.constant 0 : index
    %c6 = arith.constant 6 : index
    %42 = vector.load %arg4[%c0_18, %c6] : memref<16x8xf32, #tpu.memory_space<vmem>>, vector<16x1xf32>
    %43 = vector.broadcast %42 : vector<16x1xf32> to vector<16x128xf32>
    %44 = arith.mulf %41, %43 : vector<16x128xf32>
    %45 = arith.addf %40, %44 : vector<16x128xf32>
    %46 = vector.extract_strided_slice %8 {offsets = [0, 7], sizes = [16, 128], strides = [1, 1]} : vector<16x256xf32> to vector<16x128xf32>
    %c0_19 = arith.constant 0 : index
    %c7 = arith.constant 7 : index
    %47 = vector.load %arg4[%c0_19, %c7] : memref<16x8xf32, #tpu.memory_space<vmem>>, vector<16x1xf32>
    %48 = vector.broadcast %47 : vector<16x1xf32> to vector<16x128xf32>
    %49 = arith.mulf %46, %48 : vector<16x128xf32>
    %50 = arith.addf %45, %49 : vector<16x128xf32>
    %c0_20 = arith.constant 0 : index
    %c0_21 = arith.constant 0 : index
    %c0_22 = arith.constant 0 : index
    %51 = vector.load %arg6[%c0_20, %c0_21, %c0_22] : memref<2x16x128xbf16, #tpu.memory_space<vmem>>, vector<1x16x128xbf16>
    %52 = vector.shape_cast %51 : vector<1x16x128xbf16> to vector<16x128xbf16>
    %53 = arith.extf %52 : vector<16x128xbf16> to vector<16x128xf32>
    %54 = math.exp %50 : vector<16x128xf32>
    %55 = arith.mulf %53, %50 : vector<16x128xf32>
    %56 = arith.subf %54, %55 : vector<16x128xf32>
    %c0_23 = arith.constant 0 : index
    %c0_24 = arith.constant 0 : index
    %c0_25 = arith.constant 0 : index
    %57 = vector.load %arg7[%c0_23, %c0_24, %c0_25] : memref<2x1x128xf32, #tpu.memory_space<vmem>>, vector<1x1x128xf32>
    %58 = vector.shape_cast %57 : vector<1x1x128xf32> to vector<1x128xf32>
    %59 = vector.broadcast %58 : vector<1x128xf32> to vector<16x128xf32>
    %60 = arith.mulf %56, %59 : vector<16x128xf32>
    %cst_26 = arith.constant dense<0.000000e+00> : vector<128xf32>
    %61 = vector.multi_reduction <add>, %60, %cst_26 [0] : vector<16x128xf32> to vector<128xf32>
    %62 = vector.shape_cast %61 : vector<128xf32> to vector<1x128xf32>
    %c0_27 = arith.constant 0 : index
    %c0_28 = arith.constant 0 : index
    %c0_29 = arith.constant 0 : index
    %63 = vector.load %arg8[%c0_27, %c0_28, %c0_29] : memref<2x1x128xf32, #tpu.memory_space<vmem>>, vector<1x1x128xf32>
    %64 = vector.shape_cast %63 : vector<1x1x128xf32> to vector<1x128xf32>
    %65 = vector.shape_cast %62 : vector<1x128xf32> to vector<1x1x128xf32>
    tpu.vector_store %arg8[%c0_27, %c0_28, %c0_29], %65 {strides = array<i32>} : memref<2x1x128xf32, #tpu.memory_space<vmem>>, vector<1x1x128xf32>,
    %66 = vector.extract_strided_slice %3 {offsets = [0, 8], sizes = [16, 8], strides = [1, 1]} : vector<16x16xf32> to vector<16x8xf32>
    %67 = arith.truncf %66 : vector<16x8xf32> to vector<16x8xbf16>
    %c1_30 = arith.constant 1 : index
    %c0_31 = arith.constant 0 : index
    %c0_32 = arith.constant 0 : index
    %68 = vector.load %arg3[%c1_30, %c0_31, %c0_32] : memref<2x8x256xbf16, #tpu.memory_space<vmem>>, vector<1x8x256xbf16>
    %69 = vector.shape_cast %68 : vector<1x8x256xbf16> to vector<8x256xbf16>
    %cst_33 = arith.constant dense<0.000000e+00> : vector<16x256xf32>
    %70 = tpu.matmul %67, %69, %cst_33 {dimension_numbers = #tpu.dot_dimension_numbers<[1], [0], [0], [1], [0, 0, 1, 1], [], []>} : vector<16x8xbf16>, vector<8x256xbf16>, vector<16x256xf32> -> vector<16x256xf32>
    %c1_34 = arith.constant 1 : index
    %c0_35 = arith.constant 0 : index
    %c0_36 = arith.constant 0 : index
    %71 = vector.load %arg5[%c1_34, %c0_35, %c0_36] : memref<2x16x128xf32, #tpu.memory_space<vmem>>, vector<1x16x128xf32>
    %72 = vector.shape_cast %71 : vector<1x16x128xf32> to vector<16x128xf32>
    %73 = vector.extract_strided_slice %70 {offsets = [0, 0], sizes = [16, 128], strides = [1, 1]} : vector<16x256xf32> to vector<16x128xf32>
    %c0_37 = arith.constant 0 : index
    %c0_38 = arith.constant 0 : index
    %74 = vector.load %arg4[%c0_37, %c0_38] : memref<16x8xf32, #tpu.memory_space<vmem>>, vector<16x1xf32>
    %75 = vector.broadcast %74 : vector<16x1xf32> to vector<16x128xf32>
    %76 = arith.mulf %73, %75 : vector<16x128xf32>
    %77 = arith.addf %72, %76 : vector<16x128xf32>
    %78 = vector.extract_strided_slice %70 {offsets = [0, 1], sizes = [16, 128], strides = [1, 1]} : vector<16x256xf32> to vector<16x128xf32>
    %c0_39 = arith.constant 0 : index
    %c1_40 = arith.constant 1 : index
    %79 = vector.load %arg4[%c0_39, %c1_40] : memref<16x8xf32, #tpu.memory_space<vmem>>, vector<16x1xf32>
    %80 = vector.broadcast %79 : vector<16x1xf32> to vector<16x128xf32>
    %81 = arith.mulf %78, %80 : vector<16x128xf32>
    %82 = arith.addf %77, %81 : vector<16x128xf32>
    %83 = vector.extract_strided_slice %70 {offsets = [0, 2], sizes = [16, 128], strides = [1, 1]} : vector<16x256xf32> to vector<16x128xf32>
    %c0_41 = arith.constant 0 : index
    %c2_42 = arith.constant 2 : index
    %84 = vector.load %arg4[%c0_41, %c2_42] : memref<16x8xf32, #tpu.memory_space<vmem>>, vector<16x1xf32>
    %85 = vector.broadcast %84 : vector<16x1xf32> to vector<16x128xf32>
    %86 = arith.mulf %83, %85 : vector<16x128xf32>
    %87 = arith.addf %82, %86 : vector<16x128xf32>
    %88 = vector.extract_strided_slice %70 {offsets = [0, 3], sizes = [16, 128], strides = [1, 1]} : vector<16x256xf32> to vector<16x128xf32>
    %c0_43 = arith.constant 0 : index
    %c3_44 = arith.constant 3 : index
    %89 = vector.load %arg4[%c0_43, %c3_44] : memref<16x8xf32, #tpu.memory_space<vmem>>, vector<16x1xf32>
    %90 = vector.broadcast %89 : vector<16x1xf32> to vector<16x128xf32>
    %91 = arith.mulf %88, %90 : vector<16x128xf32>
    %92 = arith.addf %87, %91 : vector<16x128xf32>
    %93 = vector.extract_strided_slice %70 {offsets = [0, 4], sizes = [16, 128], strides = [1, 1]} : vector<16x256xf32> to vector<16x128xf32>
    %c0_45 = arith.constant 0 : index
    %c4_46 = arith.constant 4 : index
    %94 = vector.load %arg4[%c0_45, %c4_46] : memref<16x8xf32, #tpu.memory_space<vmem>>, vector<16x1xf32>
    %95 = vector.broadcast %94 : vector<16x1xf32> to vector<16x128xf32>
    %96 = arith.mulf %93, %95 : vector<16x128xf32>
    %97 = arith.addf %92, %96 : vector<16x128xf32>
    %98 = vector.extract_strided_slice %70 {offsets = [0, 5], sizes = [16, 128], strides = [1, 1]} : vector<16x256xf32> to vector<16x128xf32>
    %c0_47 = arith.constant 0 : index
    %c5_48 = arith.constant 5 : index
    %99 = vector.load %arg4[%c0_47, %c5_48] : memref<16x8xf32, #tpu.memory_space<vmem>>, vector<16x1xf32>
    %100 = vector.broadcast %99 : vector<16x1xf32> to vector<16x128xf32>
    %101 = arith.mulf %98, %100 : vector<16x128xf32>
    %102 = arith.addf %97, %101 : vector<16x128xf32>
    %103 = vector.extract_strided_slice %70 {offsets = [0, 6], sizes = [16, 128], strides = [1, 1]} : vector<16x256xf32> to vector<16x128xf32>
    %c0_49 = arith.constant 0 : index
    %c6_50 = arith.constant 6 : index
    %104 = vector.load %arg4[%c0_49, %c6_50] : memref<16x8xf32, #tpu.memory_space<vmem>>, vector<16x1xf32>
    %105 = vector.broadcast %104 : vector<16x1xf32> to vector<16x128xf32>
    %106 = arith.mulf %103, %105 : vector<16x128xf32>
    %107 = arith.addf %102, %106 : vector<16x128xf32>
    %108 = vector.extract_strided_slice %70 {offsets = [0, 7], sizes = [16, 128], strides = [1, 1]} : vector<16x256xf32> to vector<16x128xf32>
    %c0_51 = arith.constant 0 : index
    %c7_52 = arith.constant 7 : index
    %109 = vector.load %arg4[%c0_51, %c7_52] : memref<16x8xf32, #tpu.memory_space<vmem>>, vector<16x1xf32>
    %110 = vector.broadcast %109 : vector<16x1xf32> to vector<16x128xf32>
    %111 = arith.mulf %108, %110 : vector<16x128xf32>
    %112 = arith.addf %107, %111 : vector<16x128xf32>
    %c1_53 = arith.constant 1 : index
    %c0_54 = arith.constant 0 : index
    %c0_55 = arith.constant 0 : index
    %113 = vector.load %arg6[%c1_53, %c0_54, %c0_55] : memref<2x16x128xbf16, #tpu.memory_space<vmem>>, vector<1x16x128xbf16>
    %114 = vector.shape_cast %113 : vector<1x16x128xbf16> to vector<16x128xbf16>
    %115 = arith.extf %114 : vector<16x128xbf16> to vector<16x128xf32>
    %116 = math.exp %112 : vector<16x128xf32>
    %117 = arith.mulf %115, %112 : vector<16x128xf32>
    %118 = arith.subf %116, %117 : vector<16x128xf32>
    %c1_56 = arith.constant 1 : index
    %c0_57 = arith.constant 0 : index
    %c0_58 = arith.constant 0 : index
    %119 = vector.load %arg7[%c1_56, %c0_57, %c0_58] : memref<2x1x128xf32, #tpu.memory_space<vmem>>, vector<1x1x128xf32>
    %120 = vector.shape_cast %119 : vector<1x1x128xf32> to vector<1x128xf32>
    %121 = vector.broadcast %120 : vector<1x128xf32> to vector<16x128xf32>
    %122 = arith.mulf %118, %121 : vector<16x128xf32>
    %cst_59 = arith.constant dense<0.000000e+00> : vector<128xf32>
    %123 = vector.multi_reduction <add>, %122, %cst_59 [0] : vector<16x128xf32> to vector<128xf32>
    %124 = vector.shape_cast %123 : vector<128xf32> to vector<1x128xf32>
    %c1_60 = arith.constant 1 : index
    %c0_61 = arith.constant 0 : index
    %c0_62 = arith.constant 0 : index
    %125 = vector.load %arg8[%c1_60, %c0_61, %c0_62] : memref<2x1x128xf32, #tpu.memory_space<vmem>>, vector<1x1x128xf32>
    %126 = vector.shape_cast %125 : vector<1x1x128xf32> to vector<1x128xf32>
    %127 = vector.shape_cast %124 : vector<1x128xf32> to vector<1x1x128xf32>
    tpu.vector_store %arg8[%c1_60, %c0_61, %c0_62], %127 {strides = array<i32>} : memref<2x1x128xf32, #tpu.memory_space<vmem>>, vector<1x1x128xf32>,
    return
  }
  func.func @transform_0(%arg0: i32) -> (i32, i32) {
    %c0_i32 = arith.constant 0 : i32
    %c0_i32_0 = arith.constant 0 : i32
    %c0_i32_1 = arith.constant 0 : i32
    return %c0_i32, %c0_i32_0 : i32, i32
  }
  func.func @transform_1(%arg0: i32) -> (i32, i32, i32) {
    %c0_i32 = arith.constant 0 : i32
    %c0_i32_0 = arith.constant 0 : i32
    %c0_i32_1 = arith.constant 0 : i32
    return %arg0, %c0_i32, %c0_i32_0 : i32, i32, i32
  }
  func.func @transform_2(%arg0: i32) -> (i32, i32, i32) {
    %c0_i32 = arith.constant 0 : i32
    %c0_i32_0 = arith.constant 0 : i32
    %c0_i32_1 = arith.constant 0 : i32
    return %arg0, %c0_i32, %c0_i32_0 : i32, i32, i32
  }
  func.func @transform_3(%arg0: i32) -> (i32, i32) {
    %c0_i32 = arith.constant 0 : i32
    %c0_i32_0 = arith.constant 0 : i32
    %c0_i32_1 = arith.constant 0 : i32
    return %c0_i32, %c0_i32_0 : i32, i32
  }
  func.func @transform_4(%arg0: i32) -> (i32, i32, i32) {
    %c0_i32 = arith.constant 0 : i32
    %c0_i32_0 = arith.constant 0 : i32
    %c0_i32_1 = arith.constant 0 : i32
    return %arg0, %c0_i32, %c0_i32_0 : i32, i32, i32
  }
  func.func @transform_5(%arg0: i32) -> (i32, i32, i32) {
    %c0_i32 = arith.constant 0 : i32
    %c0_i32_0 = arith.constant 0 : i32
    %c0_i32_1 = arith.constant 0 : i32
    return %arg0, %c0_i32, %c0_i32_0 : i32, i32, i32
  }
  func.func @transform_6(%arg0: i32) -> (i32, i32, i32) {
    %c0_i32 = arith.constant 0 : i32
    %c0_i32_0 = arith.constant 0 : i32
    %c0_i32_1 = arith.constant 0 : i32
    return %arg0, %c0_i32, %c0_i32_0 : i32, i32, i32
  }
  func.func @transform_7(%arg0: i32) -> (i32, i32, i32) {
    %c0_i32 = arith.constant 0 : i32
    %c0_i32_0 = arith.constant 0 : i32
    %c0_i32_1 = arith.constant 0 : i32
    return %arg0, %c0_i32, %c0_i32_0 : i32, i32, i32
  }
}

</mosaic_0001>

<bundles_post_ra>
// kernel: tpu_custom_call.1
= control target key start
LH: loop header
LB: loop body
LE: loop exit
PB: predicated region body
PF: predicated region fallthrough
CT: control target
= control target key end

     0   :  { %s2468_s0 = inlined_call_operand.hbm [shape: bf16[16,64], index: 0, kind: input, shape index: {}]   ;;  %s2469_s1 = inlined_call_operand.hbm [shape: bf16[2,16,64], index: 1, kind: input, shape index: {}]   ;;  %s2470_s2 = inlined_call_operand.hbm [shape: bf16[4,8,256], index: 2, kind: input, shape index: {}]   ;;  %s2471_s3 = inlined_call_operand.vmem [shape: f32[16,8], index: 3, kind: input, shape index: {}]   ;;  %s2472_s4 = inlined_call_operand.hbm [shape: f32[4,16,128], index: 4, kind: input, shape index: {}]   ;;  %s2473_s5 = inlined_call_operand.vmem [shape: bf16[4,16,128], index: 5, kind: input, shape index: {}]   ;;  %s2474_s6 = inlined_call_operand.hbm [shape: f32[4,1,128], index: 6, kind: input, shape index: {}]   ;;  %s2475_s7 = inlined_call_operand.hbm [shape: f32[4,1,128], index: 7, kind: output, shape index: {}]  }
   0x1   :  { %2489 = sst [smem:[#allocation20_spill]] %s2469_s1 }
   0x2   :  { %2490 = sst [smem:[#allocation21_spill]] %s2472_s4 }
   0x3   :  { %12 = vsyncpa [#allocation3], 0 }
   0x4   :  { %13 = vsyncpa [#allocation6], 0 }
   0x5   :  { %15 = vsyncpa [#allocation6 + $0x1], 0 }
   0x6   :  { %16 = vsyncpa [#allocation9], 0 }
   0x7   :  { %18 = vsyncpa [#allocation9 + $0x1], 0 }
   0x8   :  { %19 = vsyncpa [#allocation4], 0 }
   0x9   :  { %21 = vsyncpa [#allocation4 + $0x1], 0  ;;  %s1838_s24 = smov 0   ;;  %s1840_s25 = smov 0  }
   0xa   :  { %s1842_s26 = smov 0   ;;  %s1844_s27 = smov 0  }
   0xb LB: > { %2491 = sst [smem:[#allocation16_spill]] %s1760_s26  ;;  %s1859_s28 = sadd.s32 1, %s1764_s27   ;;  %s1764_s27 = sphi %s1844_s27, %s2518_s27   ;;  %s1760_s26 = sphi %s1842_s26, %s2520_s26   ;;  %s1756_s25 = sphi %s1840_s25, %s2522_s25   ;;  %s1752_s24 = sphi %s1838_s24, %s2521_s24  }
   0xc   : > { %2492 = sst [smem:[#allocation17_spill]] %s1859_s28  ;;  %s55_s29 = sadd.s32 1, %s1760_s26 }
   0xd   : > { %s52_s30 = ssub.s32 %s1764_s27, %s1859_s28  ;;  %p2476_p0 = scmp.ne.s32.totalorder %s1760_s26, %s1756_s25 }
   0xe   : > { %p53_p1 = scmp.eq.s32.totalorder %s52_s30, 0  ;;  %p63_p2 = scmp.eq.s32.totalorder %s1764_s27, 0 }
   0xf   : > { %p1456_p5 = scmp.lt.s32.totalorder %s1764_s27, 2  ;;  %s259_s9 = sand.u32 1, %s1764_s27  }
  0x10   : > { %s1868_s8 = scalar_select %p53_p1, %s1760_s26, %s55_s29  }
  0x11   : > { %p64_p3 = por %p63_p2, %p2476_p0  ;;  %s1877_s10 = sand.u32 1, %s1760_s26  }
  0x12   : > { %2493 = sst [smem:[#allocation18_spill]] %s1868_s8  ;;  %s1346_s11 = sshll.u32 %s1877_s10, 3 }
  0x13   : > { %s1395_s12 = sshll.u32 %s1764_s27, 7  ;;  %s2494_s1 = sld [smem:[#allocation20_spill]] }
  0x14   : > { %s263_s16 = scalar_lea.vmem [#allocation5], %s1346_s11  ;;  %p1886_p6 = pnand %p1456_p5, %p64_p3 }
  0x15   : > { %s270_s17 = sshll.u32 %s263_s16, 4  ;;  %s1894_s19 = scalar_lea.sflag [#allocation6], %s259_s9  ;;  %s1890_s17 = int_to_ptr.vmem [resolvable:$true] %s270_s17 }
  0x16   : > { %p1900_p8 = pneg %p1886_p6 }
  0x19   : > { %s1884_s15 = scalar_lea.hbm %s2494_s1, %s1395_s12  ;;  %s1559_s29 = scalar_lea.hbm %s2494_s1, 256 }
  0x1a   : > { %s1554_s20 = scalar_lea.hbm %s1884_s15, 128  ;;  %p1560_p11 = scmp.lt.s32.totalorder %s1884_s15, %s2494_s1 }
  0x1b   : > { %p1555_p7 = scmp.ne.s32.totalorder %s1884_s15, %s1554_s20  ;;  %p1561_p12 = scmp.lt.s32.totalorder %s1559_s29, %s1554_s20 }
  0x1d   : > { %p1557_p9 = pnand %p1900_p8, %p1555_p7  ;;  %p1562_p13 = por %p1561_p12, %p1560_p11 }
  0x1f   : > { %p1558_p10 = pneg %p1557_p9 }
  0x21   : > { %p1563_p1 = pnand %p1562_p13, %p1558_p10 }
  0x23   : > { %1566 = shalt.err (!%p1563_p1)
}
  0x24   : > { %s1567_s12 = scalar_lea.vmem %s1890_s17, 128  ;;  %s1766_s13 = smov [#allocation5]  }
  0x25   : > { %p1568_p2 = scmp.ne.s32.totalorder %s1890_s17, %s1567_s12  ;;  %s1572_s14 = sshll.u32 %s1766_s13, 4  ;;  %s1573_s14 = int_to_ptr.vmem [resolvable:$false] %s1572_s14 }
  0x26   : > { %s1574_s16 = scalar_lea.vmem %s1573_s14, 256  ;;  %p1575_p7 = scmp.lt.s32.totalorder %s1890_s17, %s1573_s14 }
  0x27   : > { %p1570_p3 = pnand %p1568_p2, %p1900_p8  ;;  %p1576_p9 = scmp.lt.s32.totalorder %s1574_s16, %s1567_s12 }
  0x29   : > { %p1571_p5 = pneg %p1570_p3  ;;  %p1577_p4 = por %p1576_p9, %p1575_p7 }
  0x2b   : > { %p1578_p0 = pnand %p1577_p4, %p1571_p5 }
  0x2d   : > { %1581 = shalt.err (!%p1578_p0)
}
  0x2e   : > { %s2479_s20 = smov 64   ;;  %s2480_s22 = smov 4  }
  0x2f   : > { %1441 = dma.hbm_to_vmem [thread:$0]  (!%p1886_p6), %s1884_s15, 128, %s1890_s17, %s1894_s19, %s2479_s20, %s2479_s20, %s2480_s22  }
  0x30   : > { %s1353_s23 = sshll.u32 %s1877_s10, 5  ;;  %s1399_s29 = sshll.u32 %s1764_s27, 9 }
  0x31   : > { %s2497_s4 = sld [smem:[#allocation21_spill]]  ;;  %s306_s13 = scalar_lea.vmem [#allocation8], %s1353_s23 }
  0x32   : > { %s314_s14 = sshll.u32 %s306_s13, 4  ;;  %s1937_s16 = scalar_lea.sflag [#allocation9], %s259_s9  ;;  %s1933_s14 = int_to_ptr.vmem [resolvable:$true] %s314_s14 }
  0x37   : > { %s1931_s12 = scalar_lea.hbm %s2497_s4, %s1399_s29  ;;  %s1587_s29 = scalar_lea.hbm %s2497_s4, 1024 }
  0x38   : > { %s1582_s1 = scalar_lea.hbm %s1931_s12, 512  ;;  %p1588_p11 = scmp.lt.s32.totalorder %s1931_s12, %s2497_s4 }
  0x39   : > { %p1583_p0 = scmp.ne.s32.totalorder %s1931_s12, %s1582_s1  ;;  %p1589_p12 = scmp.lt.s32.totalorder %s1587_s29, %s1582_s1 }
  0x3b   : > { %p1585_p4 = pnand %p1583_p0, %p1900_p8  ;;  %p1590_p13 = por %p1589_p12, %p1588_p11 }
  0x3d   : > { %p1586_p10 = pneg %p1585_p4 }
  0x3f   : > { %p1591_p1 = pnand %p1590_p13, %p1586_p10 }
  0x41   : > { %1594 = shalt.err (!%p1591_p1)
}
  0x42   : > { %s1595_s9 = scalar_lea.vmem %s1933_s14, 512  ;;  %s1769_s23 = smov [#allocation8]  }
  0x43   : > { %p1596_p2 = scmp.ne.s32.totalorder %s1933_s14, %s1595_s9  ;;  %s1600_s13 = sshll.u32 %s1769_s23, 4  ;;  %s1601_s13 = int_to_ptr.vmem [resolvable:$false] %s1600_s13 }
  0x44   : > { %s1602_s15 = scalar_lea.vmem %s1601_s13, 1024  ;;  %p1603_p7 = scmp.lt.s32.totalorder %s1933_s14, %s1601_s13 }
  0x45   : > { %p1598_p3 = pnand %p1596_p2, %p1900_p8  ;;  %p1604_p9 = scmp.lt.s32.totalorder %s1602_s15, %s1595_s9 }
  0x47   : > { %p1599_p5 = pneg %p1598_p3  ;;  %p1605_p0 = por %p1604_p9, %p1603_p7 }
  0x49   : > { %p1606_p4 = pnand %p1605_p0, %p1599_p5 }
  0x4b   : > { %1609 = shalt.err (!%p1606_p4)
}
  0x4c   : > { %s2477_s1 = smov 128   ;;  %s2478_s17 = smov 8  }
  0x4d   : > { %1447 = dma.hbm_to_vmem [thread:$0]  (!%p1886_p6), %s1931_s12, 512, %s1933_s14, %s1937_s16, %s2477_s1, %s2477_s1, %s2478_s17  }
  0x4e   : > { %s1964_s29 = sadd.s32 4294967295, %s1764_s27   ;;  %s1342_s30 = sadd.s32 4294967294, %s1764_s27  }
  0x4f   : > { %p68_p10 = scmp.ne.s32.totalorder %s1756_s25, %s1752_s24  ;;  %p2482_p11 = scmp.eq.s32.totalorder %s1964_s29, 0 }
  0x50   : > { %p217_p12 = scmp.eq.s32.totalorder %s1964_s29, 1  ;;  %p223_p13 = scmp.eq.s32.totalorder %s1342_s30, 1 }
  0x51   : > { %p1343_p1 = scmp.ge.s32.totalorder %s1764_s27, 1  ;;  %p1974_p2 = por %p2482_p11, %p68_p10 }
  0x52   : > { %p2499_p3 = scmp.ne.s32.totalorder %s1760_s26, %s1756_s25  ;;  %p1985_p7 = por %p223_p13, %p68_p10 }
  0x53   : > { %s2498_s11 = scalar_select %p1974_p2, 1, 0 }
  0x54   : > { %p1981_p5 = por %p217_p12, %p2499_p3  ;;  %p230_p9 = scmp.lt.s32.totalorder %s1764_s27, 3 }
  0x55   : > { %s2501_s14 = scalar_select %p1985_p7, 1, 0 }
  0x56   : > { %s2500_s12 = scalar_select %p1981_p5, 1, 0 }
  0x57   : > { %2502 = sst [smem:[#allocation19_spill]] %s2501_s14  ;;  %p1990_p0 = pnand %p1343_p1, %p230_p9 }
  0x58   : > { %s1772_s23 = smov [#allocation2]   ;;  %s1349_s15 = sshll.u32 %s1877_s10, 4 }
  0x59   : > { %s2503_s9 = scalar_select %p1990_p0, 1, 0 }
  0x5a   : > { %s242_s13 = sshll.u32 %s1772_s23, 4  ;;  %p1434_p4 = pneg %p1990_p0  ;;  %s243_s13 = int_to_ptr.vmem [resolvable:$true] %s242_s13 }
  0x5b   : > { %s1397_s30 = sshll.u32 %s1764_s27, 8  ;;  %s284_s1 = scalar_lea.vmem [#allocation7], %s1349_s15 }
  0x5c   : > { %s292_s17 = sshll.u32 %s284_s1, 4  ;;  %p2000_p10 = pnand %p1434_p4, %p2482_p11  ;;  %s2009_s17 = int_to_ptr.vmem [resolvable:$true] %s292_s17 }
  0x5d   : > { %s2007_s8 = scalar_lea.hbm %s2470_s2, %s1397_s30  ;;  %s1621_s26 = scalar_lea.vmem %s243_s13, 128 }
  0x5e   : > { %p1612_p12 = pneg %p2000_p10  ;;  %p1622_p13 = scmp.ne.s32.totalorder %s243_s13, %s1621_s26 }
  0x5f   : > { %p1629_p9 = scmp.lt.s32.totalorder %s243_s13, %s243_s13  ;;  %p1630_p4 = scmp.lt.s32.totalorder %s1621_s26, %s1621_s26 }
  0x60   : > { %p1624_p1 = pnand %p1622_p13, %p1612_p12 }
  0x61   : > { %p1631_p11 = por %p1630_p4, %p1629_p9 }
  0x62   : > { %p1625_p3 = pneg %p1624_p1 }
  0x64   : > { %p1632_p7 = pnand %p1631_p11, %p1625_p3 }
  0x66   : > { %1635 = shalt.err (!%p1632_p7)
}
  0x67   : > { %s2505_s4 = smov 4   ;;  %s2506_s22 = smov 64  }
  0x68   : > { %1437 = dma.hbm_to_vmem [thread:$0]  (!%p2000_p10), %s2468_s0, 128, %s243_s13, [#allocation3], %s2506_s22, %s2506_s22, %s2505_s4  }
  0x69   : > { %s1636_s30 = scalar_lea.hbm %s2007_s8, 256  ;;  %s1641_s20 = scalar_lea.hbm %s2470_s2, 512 }
  0x6a   : > { %p1637_p12 = scmp.ne.s32.totalorder %s2007_s8, %s1636_s30  ;;  %p1642_p11 = scmp.lt.s32.totalorder %s2007_s8, %s2470_s2 }
  0x6b   : > { %p1643_p7 = scmp.lt.s32.totalorder %s1641_s20, %s1636_s30 }
  0x6c   : > { %p1639_p13 = pnand %p1637_p12, %p1900_p8 }
  0x6d   : > { %p1644_p3 = por %p1643_p7, %p1642_p11 }
  0x6e   : > { %p1640_p1 = pneg %p1639_p13 }
  0x70   : > { %p1645_p9 = pnand %p1644_p3, %p1640_p1 }
  0x72   : > { %1648 = shalt.err (!%p1645_p9)
}
  0x73   : > { %s1649_s13 = scalar_lea.vmem %s2009_s17, 256  ;;  %s1773_s4 = smov [#allocation7]  }
  0x74   : > { %p1650_p10 = scmp.ne.s32.totalorder %s2009_s17, %s1649_s13  ;;  %s1654_s23 = sshll.u32 %s1773_s4, 4  ;;  %s1655_s23 = int_to_ptr.vmem [resolvable:$false] %s1654_s23 }
  0x75   : > { %s1656_s22 = scalar_lea.vmem %s1655_s23, 512  ;;  %p1657_p13 = scmp.lt.s32.totalorder %s2009_s17, %s1655_s23 }
  0x76   : > { %p1652_p4 = pnand %p1650_p10, %p1900_p8  ;;  %p1658_p5 = scmp.lt.s32.totalorder %s1656_s22, %s1649_s13 }
  0x78   : > { %p1653_p12 = pneg %p1652_p4  ;;  %p1659_p2 = por %p1658_p5, %p1657_p13 }
  0x7a   : > { %p1660_p0 = pnand %p1659_p2, %p1653_p12 }
  0x7c   : > { %1663 = shalt.err (!%p1660_p0)
}
  0x7d   : > { %s2507_s28 = smov 8   ;;  %s2508_s14 = smov 128  }
  0x7e   : > { %1444 = dma.hbm_to_vmem [thread:$0]  (!%p1886_p6), %s2007_s8, 256, %s2009_s17, %s1894_s19, %s2508_s14, %s2508_s14, %s2507_s28  }
  0x7f   : > { %s1400_s1 = sshll.u32 %s1764_s27, 5  ;;  %s2509_s15 = sshll.u32 %s1877_s10, 1 }
  0x80   : > { %s338_s30 = scalar_lea.vmem [#allocation10], %s2509_s15  ;;  %s2052_s4 = scalar_lea.hbm %s2474_s6, %s1400_s1 }
  0x81   : > { %s345_s26 = sshll.u32 %s338_s30, 4  ;;  %s1664_s23 = scalar_lea.hbm %s2052_s4, 32  ;;  %s2054_s26 = int_to_ptr.vmem [resolvable:$true] %s345_s26 }
  0x82   : > { %p1665_p2 = scmp.ne.s32.totalorder %s2052_s4, %s1664_s23  ;;  %s1669_s10 = scalar_lea.hbm %s2474_s6, 64 }
  0x83   : > { %p1670_p1 = scmp.lt.s32.totalorder %s2052_s4, %s2474_s6  ;;  %p1671_p11 = scmp.lt.s32.totalorder %s1669_s10, %s1664_s23 }
  0x84   : > { %p1667_p5 = pnand %p1665_p2, %p1900_p8 }
  0x85   : > { %p1672_p7 = por %p1671_p11, %p1670_p1 }
  0x86   : > { %p1668_p0 = pneg %p1667_p5 }
  0x88   : > { %p1673_p3 = pnand %p1672_p7, %p1668_p0 }
  0x8a   : > { %1676 = shalt.err (!%p1673_p3)
}
  0x8b   : > { %s1677_s28 = scalar_lea.vmem %s2054_s26, 32  ;;  %s1774_s14 = smov [#allocation10]  }
  0x8c   : > { %p1678_p9 = scmp.ne.s32.totalorder %s2054_s26, %s1677_s28  ;;  %s1682_s1 = sshll.u32 %s1774_s14, 4  ;;  %s1683_s1 = int_to_ptr.vmem [resolvable:$false] %s1682_s1 }
  0x8d   : > { %s1684_s15 = scalar_lea.vmem %s1683_s1, 64  ;;  %p1685_p12 = scmp.lt.s32.totalorder %s2054_s26, %s1683_s1 }
  0x8e   : > { %p1680_p10 = pnand %p1678_p9, %p1900_p8  ;;  %p1686_p13 = scmp.lt.s32.totalorder %s1684_s15, %s1677_s28 }
  0x90   : > { %p1681_p4 = pneg %p1680_p10  ;;  %p1687_p2 = por %p1686_p13, %p1685_p12 }
  0x92   : > { %p1688_p5 = pnand %p1687_p2, %p1681_p4 }
  0x94   : > { %1691 = shalt.err (!%p1688_p5)
}
  0x95   : > { %s1775_s30 = smov 16   ;;  %s1776_s20 = smov 1  }
  0x96   : > { %1450 = dma.hbm_to_vmem [thread:$0]  (!%p1886_p6), %s2052_s4, 32, %s2054_s26, %s1937_s16, %s1775_s30, %s1775_s30, %s1776_s20  }
  0x97   : > { %p2510_p8 = scmp.ne.s32.totalorder %s2503_s9, 0 }
  0x98   : > { %p2511_p0 = scmp.eq.s32.totalorder (!%p2510_p8), %s1964_s29, 0 }
  0x99   : > { %357 = sbr.rel (%p2510_p8) target bundleno = 905 (0x389), region = 48 }
  0x9e   : > { %1735 = dma.done.wait (%p2511_p0), [#allocation3], 128   ;;  %p2512_p1 = pmov %p2511_p0 }
  0x9f   : > { %s363_s21 = sand.u32 1, %s1964_s29   ;;  %s2085_s13 = sand.u32 1, %s1756_s25  }
  0xa0   : > { %1737 = vsyncadd (%p2512_p1), [#allocation3], 4294967168  ;;  %s1362_s23 = sshll.u32 %s2085_s13, 3  ;;  %s364_s8 = scalar_lea.sflag [#allocation6], %s363_s21 }
  0xa1   : > { %s367_s18 = scalar_lea.vmem [#allocation5], %s1362_s23  ;;  %p2513_p6 = scmp.ne.s32.totalorder %s2498_s11, 0 }
  0xa3   : > { %1739 = dma.done.wait (%p2513_p6), %s364_s8, 384  }
  0xa4   : > { %1741 = vsyncadd (%p2513_p6), %s364_s8, 4294966912  ;;  %s1363_s16 = sshll.u32 %s2085_s13, 4  ;;  %s1364_s9 = sshll.u32 %s2085_s13, 5 }
  0xa5   : > { %s2094_s26 = scalar_lea.vmem [#allocation7], %s1363_s16  ;;  %s382_s4 = scalar_lea.sflag [#allocation9], %s363_s21 }
  0xa6   : > { %s2096_s19 = scalar_lea.vmem [#allocation8], %s1364_s9 }
  0xa7   : > { %1743 = dma.done.wait (%p2513_p6), %s382_s4, 544  }
  0xa8   : > { %1745 = vsyncadd (%p2513_p6), %s382_s4, 4294966752  ;;  %v1777_v0 = vmov 0.0   ;;  %vm1778_vm0 = vmmov 0   ;;  %v1779_v1 = vmov 0   ;;  %vm472_vm1 = vcmask 523264   ;;  %v1540_v2 = vld [vmem:[%s367_s18] sm:$0xff]  }
  0xa9   : > { %1414 = vmatprep.subr.bf16.mxu0 %v1777_v0  ;;  %1416 = vmatprep.mubr.msk.bf16.mxu0 %vm1778_vm0, %v1777_v0  ;;  %v477_v3 = vsel %vm472_vm1, %v1540_v2, 0  ;;  %v1541_v4 = vld [vmem:[#allocation2] sm:$0xff]   ;;  %v2107_v5 = vld [vmem:[%s2471_s3 + $0x8] sm:$0xff]  ;;  %vm531_vm2 = vcmask 1043456   ;;  %v1780_v10 = vmov 1   ;;  %v1781_v12 = vmov 3  }
  0xaa   : > { %1518 = vset.pattern.permute.xlu1 %v1779_v1  ;;  %570 = vmatprep.mubr.bf16.mxu1 %v1779_v1  ;;  %v521_v6 = vld [vmem:[%s2094_s26] sm:$0xff]  ;;  %v2116_v11 = vld [vmem:[%s2471_s3] sm:$0xff]  ;;  %v1782_v13 = vmov 2   ;;  %v1783_v14 = vmov 4   ;;  %v1784_v15 = vmov 5   ;;  %v1785_v20 = vmov 6  }
  0xab   : > { %1415 = vmatpush3.bf16.xpose.msra.mxu0 %v477_v3  ;;  %592 = vperm.xlu1 %1518, %v2107_v5   ;;  %v1374_v7 = vcombine.high %v521_v6, %v521_v6  ;;  %v1373_v8 = vcombine.low %v521_v6, %v521_v6  ;;  %v1378_v16 = vld [vmem:[%s2094_s26 + $0x8] sm:$0xff]  ;;  %v1786_v21 = vmov 7   ;;  %vm527_vm3 = vcmask 64512   ;;  %s1787_s28 = smov 120   ;;  %s1788_s14 = smov 126  }
  0xac   : > { %1522 = vset.pattern.permute.xlu0 %v1781_v12  ;;  %v1380_v17 = vcombine.high %v1378_v16, %v1378_v16  ;;  %v1379_v18 = vcombine.low %v1378_v16, %v1378_v16  ;;  %s1789_s1 = smov 127   ;;  %s1790_s15 = smov 125   ;;  %vm623_vm4 = vcmask 1039360   ;;  %vm654_vm5 = vcmask 1031168  }
  0xad   : > { %1375 = vmatprep.subr.msk.bf16.mxu1 %vm531_vm2, %v1374_v7  ;;  %v533_v9 = vsel %vm531_vm2, %v1373_v8, 0  ;;  %s1791_s30 = smov 123   ;;  %s1792_s20 = smov 124   ;;  %vm685_vm6 = vcmask 1022976   ;;  %vm716_vm7 = vcmask 1014784   ;;  %vm747_vm8 = vcmask 1006592  }
  0xae   : > { %553 = vmatpush1.bf16.msra.mxu1 %v533_v9  ;;  %v859_v19 = vsel %vm531_vm2, %v1379_v18, 0  ;;  %s1793_s21 = smov 122   ;;  %s1794_s23 = smov 121   ;;  %vm778_vm9 = vcmask 998400   ;;  %vm809_vm10 = vcmask 990208  }
  0xaf   : > { %1519 = vset.pattern.permute.xlu1 %v1780_v10  ;;  %1381 = vmatprep.subr.msk.bf16.mxu1 %vm531_vm2, %v1380_v17  ;;  %s1367_s8 = sshll.u32 %s1964_s29, 1  ;;  %s1365_s4 = sshll.u32 %s2085_s13, 1 }
  0xb0   : > { %600 = vperm.xlu1 %1519, %v2116_v11   ;;  %p449_p11 = scmp.lt.s32.totalorder %s1367_s8, 3  ;;  %s2391_s10 = scalar_lea.vmem [#allocation10], %s1365_s4 }
  0xb1   : > { %s2394_s17 = scalar_lea.vmem [#allocation11], %s1365_s4  ;;  %s1402_s11 = sshll.u32 %s1964_s29, 5 }
  0xb2   : > { %1417 = vmatmul.mubr.msk.bf16.vlgmr.msra.gmra.mxu0 %vm472_vm1, %v1541_v4  ;;  %s2524_s8 = smov (!%p449_p11, %s1367_s8), 3  ;;  %p2514_p3 = scmp.ne.s32.totalorder %s2500_s12, 0 }
  0xb3   : > { %s1401_s18 = sshll.u32 %s2524_s8, 3  ;;  %s1795_s29 = smov [#allocation11]  }
  0xb4   : > { %604 = vperm.xlu1 %1519, %v2107_v5   ;;  %s2387_s26 = scalar_lea.vmem %s2473_s5, %s1401_s18 }
  0xb8   : > { %1520 = vset.pattern.permute.xlu1 %v1782_v13 }
  0xb9   : > { %635 = vperm.xlu1 %1520, %v2107_v5  }
  0xbd   : > { %1521 = vset.pattern.permute.xlu1 %v1781_v12 }
  0xbe   : > { %662 = vperm.xlu1 %1521, %v2116_v11  }
  0xc2   : > { %1523 = vset.pattern.permute.xlu1 %v1783_v14 }
  0xc3   : > { %697 = vperm.xlu1 %1523, %v2107_v5  }
  0xc7   : > { %1526 = vset.pattern.permute.xlu1 %v1780_v10 }
  0xc8   : > { %931 = vperm.xlu1 %1526, %v2107_v5  }
  0xcc   : > { %1527 = vset.pattern.permute.xlu1 %v1782_v13 }
  0xcd   : > { %957 = vperm.xlu1 %1527, %v2116_v11  }
  0xd1   : > { %1529 = vset.pattern.permute.xlu1 %v1781_v12 }
  0xd2   : > { %987 = vperm.xlu1 %1529, %v2116_v11  }
  0xd6   : > { %991 = vperm.xlu1 %1529, %v2107_v5  }
  0xda   : > { %1530 = vset.pattern.permute.xlu1 %v1783_v14 }
  0xdb   : > { %1021 = vperm.xlu1 %1530, %v2107_v5  }
  0xdf   : > { %1531 = vset.pattern.permute.xlu1 %v1784_v15 }
  0xe0   : > { %724 = vperm.xlu1 %1531, %v2116_v11  }
  0xe4   : > { %1047 = vperm.xlu1 %1531, %v2116_v11  }
  0xe8   : > { %1051 = vperm.xlu1 %1531, %v2107_v5  }
  0xec   : > { %1534 = vset.pattern.permute.xlu1 %v1785_v20 }
  0xed   : > { %759 = vperm.xlu1 %1534, %v2107_v5  }
  0xf1   : > { %1077 = vperm.xlu1 %1534, %v2116_v11  }
  0xf5   : > { %1535 = vset.pattern.permute.xlu1 %v1786_v21 }
  0xf6   : > { %786 = vperm.xlu1 %1535, %v2116_v11  }
  0xfa   : > { %1107 = vperm.xlu1 %1535, %v2116_v11  }
  0xfe   : > { %1111 = vperm.xlu1 %1535, %v2107_v5  }
 0x102   : > { %1538 = vset.pattern.permute.xlu1 %v1779_v1 }
 0x103   : > { %919 = vperm.xlu1 %1538, %v2107_v5  }
 0x126   : > { %v2156_v27 = vpop.permute.xlu1 %592 }
 0x12b   : > { %v601_v28 = vpop.permute.xlu1 %600 }
 0x12f   : > { %v2159_v30 = vpop.permute.xlu1 %604 }
 0x134   : > { %v2161_v31 = vpop.permute.xlu1 %635 }
 0x139   : > { %v663_v32 = vpop.permute.xlu1 %662 }
 0x13e   : > { %v2163_v33 = vpop.permute.xlu1 %697 }
 0x143   : > { %v2165_v34 = vpop.permute.xlu1 %931 }
 0x148   : > { %v2167_v35 = vpop.permute.xlu1 %957 }
 0x14d   : > { %v2169_v36 = vpop.permute.xlu1 %987 }
 0x151   : > { %v2173_v38 = vpop.permute.xlu1 %991 }
 0x156   : > { %v2177_v40 = vpop.permute.xlu1 %1021 }
 0x15b   : > { %v725_v42 = vpop.permute.xlu1 %724 }
 0x15f   : > { %v2181_v44 = vpop.permute.xlu1 %1047 }
 0x163   : > { %v2183_v46 = vpop.permute.xlu1 %1051 }
 0x168   : > { %v2187_v48 = vpop.permute.xlu1 %759 }
 0x16c   : > { %v2197_v53 = vpop.permute.xlu1 %1077 }
 0x171   : > { %v787_v59 = vpop.permute.xlu1 %786 }
 0x172   : > { %v513_v22 = vpop.f32.mrf.mxu0 }
 0x174   : > { %v1418_v23 = vpop.f32.mrf.mxu0 }
 0x175   : > { %v2253_v23 = vpop.permute.xlu1 %1107 }
 0x176   : > { %v516_v24 = vpop.f32.mrf.mxu0 }
 0x177   : > { %v520_v25 = vpack.c.bf16 %v516_v24, %v513_v22 }
 0x178   : > { %v1419_v26 = vpop.f32.mrf.mxu0 }
 0x179   : > { %848 = vrot.lane.b32.xlu0 %v520_v25, %s1787_s28  ;;  %1376 = vmatmul.mubr.msk.bf16.vlgmr.msra.gmra.mxu1 %vm527_vm3, %v520_v25  ;;  %v2255_v25 = vpop.permute.xlu1 %1111 }
 0x17a   : > { %879 = vmatpush1.bf16.msra.mxu1 %v859_v19  ;;  %896 = vmatprep.mubr.bf16.mxu1 %v1779_v1 }
 0x17d   : > { %666 = vperm.xlu0 %1522, %v2107_v5  }
 0x17e   : > { %v920_v26 = vpop.permute.xlu1 %919 }
 0x181   : > { %1524 = vset.pattern.permute.xlu0 %v1780_v10 }
 0x182   : > { %927 = vperm.xlu0 %1524, %v2116_v11  }
 0x186   : > { %1525 = vset.pattern.permute.xlu0 %v1782_v13 }
 0x187   : > { %631 = vperm.xlu0 %1525, %v2116_v11  }
 0x18b   : > { %961 = vperm.xlu0 %1525, %v2107_v5  }
 0x18f   : > { %1528 = vset.pattern.permute.xlu0 %v1783_v14 }
 0x190   : > { %693 = vperm.xlu0 %1528, %v2116_v11  }
 0x194   : > { %1017 = vperm.xlu0 %1528, %v2116_v11  }
 0x198   : > { %1532 = vset.pattern.permute.xlu0 %v1784_v15 }
 0x199   : > { %728 = vperm.xlu0 %1532, %v2107_v5  }
 0x19d   : > { %1533 = vset.pattern.permute.xlu0 %v1785_v20 }
 0x19e   : > { %755 = vperm.xlu0 %1533, %v2116_v11  }
 0x1a2   : > { %1081 = vperm.xlu0 %1533, %v2107_v5  }
 0x1a6   : > { %1536 = vset.pattern.permute.xlu0 %v1786_v21 }
 0x1a7   : > { %790 = vperm.xlu0 %1536, %v2107_v5  }
 0x1ab   : > { %1537 = vset.pattern.permute.xlu0 %v1779_v1 }
 0x1ac   : > { %587 = vperm.xlu0 %1537, %v2116_v11  }
 0x1b0   : > { %914 = vperm.xlu0 %1537, %v2116_v11  }
 0x1b4   : > { %1539 = vset.pattern.permute.xlu0 %v1786_v21 }
 0x1eb   : > { %v849_v29 = vpop.permute.xlu0 %848 }
 0x1ec   : > { %1382 = vmatmul.mubr.msk.bf16.vlgmr.msra.gmra.mxu1 %vm527_vm3, %v849_v29 }
 0x1f8   : > { %v2171_v37 = vpop.permute.xlu0 %666 }
 0x1fd   : > { %v2175_v39 = vpop.permute.xlu0 %927 }
 0x202   : > { %v632_v41 = vpop.permute.xlu0 %631 }
 0x206   : > { %v2179_v43 = vpop.permute.xlu0 %961 }
 0x20b   : > { %v694_v45 = vpop.permute.xlu0 %693 }
 0x20f   : > { %v2185_v47 = vpop.permute.xlu0 %1017 }
 0x214   : > { %v2193_v52 = vpop.permute.xlu0 %728 }
 0x219   : > { %v756_v56 = vpop.permute.xlu0 %755 }
 0x21d   : > { %v2228_v10 = vpop.permute.xlu0 %1081 }
 0x222   : > { %v791_v14 = vpop.permute.xlu0 %790 }
 0x227   : > { %v588_v24 = vpop.permute.xlu0 %587 }
 0x239   : > { %v2189_v49 = vpop.f32.mrf.mxu1 }
 0x23a   : > { %v638_v50 = vmul.f32 %v632_v41, %v2189_v49  ;;  %v607_v51 = vmul.f32 %v601_v28, %v2189_v49  ;;  %v669_v54 = vmul.f32 %v663_v32, %v2189_v49  ;;  %v731_v55 = vmul.f32 %v725_v42, %v2189_v49 }
 0x23b   : > { %v700_v57 = vmul.f32 %v694_v45, %v2189_v49  ;;  %v762_v58 = vmul.f32 %v756_v56, %v2189_v49  ;;  %v574_v60 = vpop.f32.mrf.mxu1  ;;  %v793_v61 = vmul.f32 %v787_v59, %v2189_v49 }
 0x23c   : > { %646 = vrot.lane.b32.xlu1 %v638_v50, %s1788_s14  ;;  %615 = vrot.lane.b32.xlu0 %v607_v51, %s1789_s1  ;;  %v608_v62 = vmul.f32 %v601_v28, %v574_v60  ;;  %v639_v63 = vmul.f32 %v632_v41, %v574_v60  ;;  %v670_v0 = vmul.f32 %v663_v32, %v574_v60  ;;  %v915_v28 = vpop.permute.xlu0 %914 }
 0x23d   : > { %v2210_v1 = vpop.f32.mrf.mxu1  ;;  %v701_v2 = vmul.f32 %v694_v45, %v574_v60  ;;  %v732_v4 = vmul.f32 %v725_v42, %v574_v60  ;;  %v763_v6 = vmul.f32 %v756_v56, %v574_v60  ;;  %v794_v8 = vmul.f32 %v787_v59, %v574_v60 }
 0x23e   : > { %v609_v3 = vmul.f32 %v2159_v30, %v2210_v1  ;;  %v671_v5 = vmul.f32 %v2171_v37, %v2210_v1  ;;  %v702_v7 = vmul.f32 %v2163_v33, %v2210_v1  ;;  %v733_v9 = vmul.f32 %v2193_v52, %v2210_v1 }
 0x23f   : > { %v640_v11 = vmul.f32 %v2161_v31, %v2210_v1  ;;  %v764_v12 = vmul.f32 %v2187_v48, %v2210_v1  ;;  %v578_v13 = vpop.f32.mrf.mxu1  ;;  %v795_v15 = vmul.f32 %v791_v14, %v2210_v1 }
 0x240   : > { %677 = vrot.lane.b32.xlu1 %v669_v54, %s1790_s15  ;;  %739 = vrot.lane.b32.xlu0 %v731_v55, %s1791_s30  ;;  %v610_v16 = vmul.f32 %v2159_v30, %v578_v13  ;;  %v641_v17 = vmul.f32 %v2161_v31, %v578_v13  ;;  %v672_v18 = vmul.f32 %v2171_v37, %v578_v13 }
 0x241   : > { %v703_v19 = vmul.f32 %v2163_v33, %v578_v13  ;;  %v734_v20 = vmul.f32 %v2193_v52, %v578_v13  ;;  %v765_v21 = vmul.f32 %v2187_v48, %v578_v13  ;;  %v796_v22 = vmul.f32 %v791_v14, %v578_v13 }
 0x242   : > { %v595_v13 = vmul.f32 %v588_v24, %v2189_v49 }
 0x244   : > { %708 = vrot.lane.b32.xlu1 %v700_v57, %s1792_s20  ;;  %770 = vrot.lane.b32.xlu0 %v762_v58, %s1793_s21 }
 0x248   : > { %801 = vrot.lane.b32.xlu0 %v793_v61, %s1794_s23  ;;  %617 = vrot.lane.b32.xlu1 %v608_v62, %s1789_s1 }
 0x24c   : > { %648 = vrot.lane.b32.xlu0 %v639_v63, %s1788_s14  ;;  %679 = vrot.lane.b32.xlu1 %v670_v0, %s1790_s15 }
 0x250   : > { %710 = vrot.lane.b32.xlu1 %v701_v2, %s1792_s20  ;;  %619 = vrot.lane.b32.xlu0 %v609_v3, %s1789_s1 }
 0x254   : > { %741 = vrot.lane.b32.xlu1 %v732_v4, %s1791_s30  ;;  %681 = vrot.lane.b32.xlu0 %v671_v5, %s1790_s15 }
 0x258   : > { %772 = vrot.lane.b32.xlu1 %v763_v6, %s1793_s21  ;;  %712 = vrot.lane.b32.xlu0 %v702_v7, %s1792_s20 }
 0x25c   : > { %803 = vrot.lane.b32.xlu1 %v794_v8, %s1794_s23  ;;  %743 = vrot.lane.b32.xlu0 %v733_v9, %s1791_s30 }
 0x260   : > { %650 = vrot.lane.b32.xlu1 %v640_v11, %s1788_s14  ;;  %774 = vrot.lane.b32.xlu0 %v764_v12, %s1793_s21 }
 0x264   : > { %805 = vrot.lane.b32.xlu0 %v795_v15, %s1794_s23  ;;  %621 = vrot.lane.b32.xlu1 %v610_v16, %s1789_s1  ;;  %v581_v16 = vld [vmem:[%s2096_s19] sm:$0xff] }
 0x268   : > { %652 = vrot.lane.b32.xlu0 %v641_v17, %s1788_s14  ;;  %683 = vrot.lane.b32.xlu1 %v672_v18, %s1790_s15 }
 0x26c   : > { %714 = vrot.lane.b32.xlu1 %v703_v19, %s1792_s20 }
 0x270   : > { %745 = vrot.lane.b32.xlu1 %v734_v20, %s1791_s30  ;;  %v597_v20 = vadd.f32 %v595_v13, %v581_v16 }
 0x274   : > { %776 = vrot.lane.b32.xlu1 %v765_v21, %s1793_s21 }
 0x278   : > { %807 = vrot.lane.b32.xlu1 %v796_v22, %s1794_s23 }
 0x2ac   : > { %v2257_v29 = vpop.f32.mrf.mxu1 }
 0x2ad   : > { %v1024_v30 = vmul.f32 %v2185_v47, %v2257_v29  ;;  %v934_v31 = vmul.f32 %v2175_v39, %v2257_v29  ;;  %v2266_v37 = vmul.f32 %v915_v28, %v2257_v29  ;;  %v1054_v45 = vmul.f32 %v2181_v44, %v2257_v29 }
 0x2ae   : > { %v2263_v32 = vpop.permute.xlu1 %646  ;;  %v616_v33 = vpop.permute.xlu0 %615  ;;  %v964_v48 = vmul.f32 %v2167_v35, %v2257_v29  ;;  %v1084_v52 = vmul.f32 %v2197_v53, %v2257_v29  ;;  %v994_v54 = vmul.f32 %v2169_v36, %v2257_v29 }
 0x2af   : > { %v900_v41 = vpop.f32.mrf.mxu1  ;;  %1032 = vrot.lane.b32.xlu0 %v1024_v30, %s1792_s20  ;;  %942 = vrot.lane.b32.xlu1 %v934_v31, %s1789_s1  ;;  %v596_v31 = vmul.f32 %v2156_v27, %v2210_v1 }
 0x2b0   : > { %v935_v58 = vmul.f32 %v2175_v39, %v900_v41  ;;  %v1025_v59 = vmul.f32 %v2185_v47, %v900_v41  ;;  %v965_v62 = vmul.f32 %v2167_v35, %v900_v41  ;;  %v1055_v63 = vmul.f32 %v2181_v44, %v900_v41 }
 0x2b1   : > { %v2270_v42 = vpop.f32.mrf.mxu1  ;;  %v995_v39 = vmul.f32 %v2169_v36, %v900_v41  ;;  %v1085_v47 = vmul.f32 %v2197_v53, %v900_v41  ;;  %v1115_v19 = vmul.f32 %v2253_v23, %v900_v41  ;;  %v582_v41 = vld [vmem:[%s2096_s19 + $0x8] sm:$0xff] }
 0x2b2   : > { %v2276_v50 = vpop.permute.xlu1 %677  ;;  %v2278_v51 = vpop.permute.xlu0 %739  ;;  %v2287_v55 = vmul.f32 %v920_v26, %v2270_v42  ;;  %v1026_v35 = vmul.f32 %v2177_v40, %v2270_v42  ;;  %v936_v44 = vmul.f32 %v2165_v34, %v2270_v42  ;;  %v1056_v36 = vmul.f32 %v2183_v46, %v2270_v42 }
 0x2b3   : > { %1062 = vrot.lane.b32.xlu0 %v1054_v45, %s1791_s30  ;;  %972 = vrot.lane.b32.xlu1 %v964_v48, %s1788_s14  ;;  %v966_v53 = vmul.f32 %v2179_v43, %v2270_v42  ;;  %v904_v9 = vpop.f32.mrf.mxu1  ;;  %v1086_v11 = vmul.f32 %v2228_v10, %v2270_v42  ;;  %v996_v12 = vmul.f32 %v2173_v38, %v2270_v42 }
 0x2b4   : > { %v937_v18 = vmul.f32 %v2165_v34, %v904_v9  ;;  %v967_v26 = vmul.f32 %v2179_v43, %v904_v9  ;;  %v1027_v28 = vmul.f32 %v2177_v40, %v904_v9  ;;  %v997_v40 = vmul.f32 %v2173_v38, %v904_v9 }
 0x2b5   : > { %v1057_v45 = vmul.f32 %v2183_v46, %v904_v9  ;;  %v1114_v46 = vmul.f32 %v2253_v23, %v2257_v29  ;;  %v1117_v29 = vmul.f32 %v2255_v25, %v904_v9 }
 0x2b6   : > { %v2289_v56 = vpop.permute.xlu1 %708  ;;  %v2291_v57 = vpop.permute.xlu0 %770 }
 0x2b7   : > { %1092 = vrot.lane.b32.xlu0 %v1084_v52, %s1793_s21  ;;  %1002 = vrot.lane.b32.xlu1 %v994_v54, %s1790_s15  ;;  %v598_v52 = vadd.f32 %v596_v31, %v582_v41 }
 0x2ba   : > { %v2297_v60 = vpop.permute.xlu0 %801  ;;  %v618_v61 = vpop.permute.xlu1 %617 }
 0x2bb   : > { %944 = vrot.lane.b32.xlu0 %v935_v58, %s1789_s1  ;;  %1034 = vrot.lane.b32.xlu1 %v1025_v59, %s1792_s20  ;;  %v624_v17 = vsel %vm623_vm4, %v616_v33, %v618_v61  ;;  %v1087_v59 = vmul.f32 %v2228_v10, %v904_v9  ;;  %v1116_v10 = vmul.f32 %v2255_v25, %v2270_v42 }
 0x2bc   : > { %v628_v24 = vadd.f32 %v624_v17, %v597_v20  ;;  %v1377_v17 = vld [vmem:[%s2391_s10] ss:$0 sm:$0xff] }
 0x2be   : > { %v649_v0 = vpop.permute.xlu0 %648  ;;  %v680_v2 = vpop.permute.xlu1 %679 }
 0x2bf   : > { %974 = vrot.lane.b32.xlu0 %v965_v62, %s1788_s14  ;;  %1064 = vrot.lane.b32.xlu1 %v1055_v63, %s1791_s30  ;;  %v655_v22 = vsel %vm654_vm5, %v2263_v32, %v649_v0  ;;  %v686_v32 = vsel %vm685_vm6, %v2276_v50, %v680_v2 }
 0x2c0   : > { %v659_v30 = vadd.f32 %v655_v22, %v628_v24 }
 0x2c2   : > { %v711_v3 = vpop.permute.xlu1 %710  ;;  %v620_v4 = vpop.permute.xlu0 %619  ;;  %v690_v48 = vadd.f32 %v686_v32, %v659_v30 }
 0x2c3   : > { %1004 = vrot.lane.b32.xlu0 %v995_v39, %s1790_s15  ;;  %1094 = vrot.lane.b32.xlu1 %v1085_v47, %s1793_s21  ;;  %v717_v54 = vsel %vm716_vm7, %v2289_v56, %v711_v3 }
 0x2c4   : > { %v721_v61 = vadd.f32 %v717_v54, %v690_v48 }
 0x2c6   : > { %v742_v5 = vpop.permute.xlu1 %741  ;;  %v2313_v6 = vpop.permute.xlu0 %681 }
 0x2c7   : > { %1036 = vrot.lane.b32.xlu0 %v1026_v35, %s1792_s20  ;;  %946 = vrot.lane.b32.xlu1 %v936_v44, %s1789_s1  ;;  %v748_v38 = vsel %vm747_vm8, %v2278_v51, %v742_v5 }
 0x2c8   : > { %v752_v0 = vadd.f32 %v748_v38, %v721_v61 }
 0x2ca   : > { %v773_v7 = vpop.permute.xlu1 %772  ;;  %v2321_v8 = vpop.permute.xlu0 %712 }
 0x2cb   : > { %1066 = vrot.lane.b32.xlu0 %v1056_v36, %s1791_s30  ;;  %976 = vrot.lane.b32.xlu1 %v966_v53, %s1788_s14  ;;  %v779_v63 = vsel %vm778_vm9, %v2291_v57, %v773_v7 }
 0x2cc   : > { %v783_v2 = vadd.f32 %v779_v63, %v752_v0 }
 0x2ce   : > { %v804_v14 = vpop.permute.xlu1 %803  ;;  %v2330_v15 = vpop.permute.xlu0 %743 }
 0x2cf   : > { %1096 = vrot.lane.b32.xlu0 %v1086_v11, %s1793_s21  ;;  %1006 = vrot.lane.b32.xlu1 %v996_v12, %s1790_s15  ;;  %v810_v51 = vsel %vm809_vm10, %v2297_v60, %v804_v14 }
 0x2d0   : > { %v814_v60 = vadd.f32 %v810_v51, %v783_v2 }
 0x2d2   : > { %v651_v21 = vpop.permute.xlu1 %650  ;;  %v775_v49 = vpop.permute.xlu0 %774  ;;  %v820_v35 = vmul.f32 1.442695, %v814_v60 }
 0x2d3   : > { %948 = vrot.lane.b32.xlu0 %v937_v18, %s1789_s1  ;;  %1124 = vrot.lane.b32.xlu1 %v1115_v19, %s1794_s23  ;;  %s1169_s1 = scalar_lea.sflag [#allocation4], %s2085_s13 }
 0x2d4   : > { %1546 = vpow2.f32 %v820_v35 }
 0x2d6   : > { %v806_v34 = vpop.permute.xlu0 %805  ;;  %v622_v33 = vpop.permute.xlu1 %621 }
 0x2d7   : > { %978 = vrot.lane.b32.xlu0 %v967_v26, %s1788_s14  ;;  %1038 = vrot.lane.b32.xlu1 %v1027_v28, %s1792_s20  ;;  %v625_v43 = vsel %vm623_vm4, %v620_v4, %v622_v33  ;;  %s2424_s14 = scalar_lea.hbm %s2475_s7, %s1402_s11 }
 0x2d8   : > { %v629_v50 = vadd.f32 %v625_v43, %v598_v52 }
 0x2da   : > { %v653_v27 = vpop.permute.xlu0 %652  ;;  %v684_v1 = vpop.permute.xlu1 %683 }
 0x2db   : > { %v656_v58 = vsel %vm654_vm5, %v651_v21, %v653_v27  ;;  %1008 = vrot.lane.b32.xlu0 %v997_v40, %s1790_s15  ;;  %1068 = vrot.lane.b32.xlu1 %v1057_v45, %s1791_s30  ;;  %v687_v23 = vsel %vm685_vm6, %v2313_v6, %v684_v1  ;;  %s1696_s30 = sshll.u32 %s1795_s29, 4  ;;  %s1697_s30 = int_to_ptr.vmem [resolvable:$false] %s1696_s30 }
 0x2dc   : > { %v660_v56 = vadd.f32 %v656_v58, %v629_v50  ;;  %v1383_v50 = vld [vmem:[%s2096_s19 + $0x10] sm:$0xff]  ;;  %s1698_s20 = scalar_lea.vmem %s1697_s30, 64 }
 0x2dd   : > { %v924_v61 = vadd.f32 %v1383_v50, %v2266_v37 }
 0x2de   : > { %v715_v62 = vpop.permute.xlu1 %714  ;;  %v691_v39 = vadd.f32 %v687_v23, %v660_v56 }
 0x2df   : > { %1122 = vrot.lane.b32.xlu0 %v1114_v46, %s1794_s23  ;;  %1098 = vrot.lane.b32.xlu1 %v1087_v59, %s1793_s21  ;;  %v718_v47 = vsel %vm716_vm7, %v2321_v8, %v715_v62  ;;  %v1404_v8 = vld [vmem:[%s2387_s26] sm:$0xff]  }
 0x2e0   : > { %v722_v4 = vadd.f32 %v718_v47, %v691_v39  ;;  %v1405_v9 = vunpack.c.l.bf16 %v1404_v8  ;;  %v1406_v11 = vunpack.c.h.bf16 %v1404_v8  ;;  %v1384_v39 = vld [vmem:[%s2096_s19 + $0x18] sm:$0xff]  ;;  %s1182_s19 = sshll.u32 %s2394_s17, 4  ;;  %s2419_s19 = int_to_ptr.vmem [resolvable:$true] %s1182_s19 }
 0x2e1   : > { %v1547_v12 = vpop.eup %1546  ;;  %s1692_s15 = scalar_lea.vmem %s2419_s19, 32  ;;  %p1699_p4 = scmp.lt.s32.totalorder %s2419_s19, %s1697_s30 }
 0x2e2   : > { %v746_v57 = vpop.permute.xlu1 %745  ;;  %v824_v13 = vmul.f32 %v1405_v9, %v814_v60  ;;  %p1693_p7 = scmp.ne.s32.totalorder %s2419_s19, %s1692_s15  ;;  %p1700_p12 = scmp.lt.s32.totalorder %s1698_s20, %s1692_s15 }
 0x2e3   : > { %1126 = vrot.lane.b32.xlu0 %v1116_v10, %s1794_s23  ;;  %1128 = vrot.lane.b32.xlu1 %v1117_v29, %s1794_s23  ;;  %v749_v3 = vsel %vm747_vm8, %v2330_v15, %v746_v57 }
 0x2e4   : > { %v753_v44 = vadd.f32 %v749_v3, %v722_v4  ;;  %v826_v14 = vsub.f32 %v1547_v12, %v824_v13  ;;  %v925_v3 = vadd.f32 %v1384_v39, %v2287_v55  ;;  %p1694_p9 = pnand %p1693_p7, %p2514_p3  ;;  %p1701_p13 = por %p1700_p12, %p1699_p4 }
 0x2e6   : > { %v777_v42 = vpop.permute.xlu1 %776  ;;  %v835_v19 = vmul.f32 %v1377_v17, %v826_v14  ;;  %p1695_p10 = pneg %p1694_p9 }
 0x2e7   : > { %v780_v25 = vsel %vm778_vm9, %v775_v49, %v777_v42 }
 0x2e8   : > { %v784_v5 = vadd.f32 %v780_v25, %v753_v44  ;;  %p1702_p2 = pnand %p1701_p13, %p1695_p10 }
 0x2ea   : > { %v808_v6 = vpop.permute.xlu1 %807 }
 0x2eb   : > { %v811_v36 = vsel %vm809_vm10, %v806_v34, %v808_v6 }
 0x2ec   : > { %v815_v53 = vadd.f32 %v811_v36, %v784_v5 }
 0x2ee   : > { %v822_v7 = vmul.f32 1.442695, %v815_v53  ;;  %v825_v15 = vmul.f32 %v1406_v11, %v815_v53 }
 0x2f0   : > { %1548 = vpow2.f32 %v822_v7 }
 0x2fd   : > { %v1549_v16 = vpop.eup %1548 }
 0x2fe   : > { %v827_v18 = vsub.f32 %v1549_v16, %v825_v15 }
 0x300   : > { %v836_v20 = vmul.f32 %v1377_v17, %v827_v18 }
 0x302   : > { %v837_v21 = vadd.f32 %v836_v20, %v835_v19 }
 0x304   : > { %v838_v49 = vrot.slane %v837_v21, 4 }
 0x306   : > { %v839_v22 = vadd.f32 %v838_v49, %v837_v21 }
 0x308   : > { %v840_v24 = vrot.slane %v839_v22, 2 }
 0x30a   : > { %v841_v26 = vadd.f32 %v840_v24, %v839_v22 }
 0x30c   : > { %v842_v28 = vrot.slane %v841_v26, 1 }
 0x30e   : > { %v843_v30 = vadd.f32 %v842_v28, %v841_v26  ;;  %v1411_v28 = vld [vmem:[%s2387_s26 + $0x8] sm:$0xff]  }
 0x310   : > { %844 = vst [vmem:[%s2394_s17] sm:$0x1] %v843_v30  ;;  %v1409_v30 = vunpack.c.l.bf16 %v1411_v28 }
 0x321   : > { %v1033_v34 = vpop.permute.xlu0 %1032  ;;  %v943_v31 = vpop.permute.xlu1 %942 }
 0x325   : > { %v1063_v33 = vpop.permute.xlu0 %1062  ;;  %v973_v41 = vpop.permute.xlu1 %972 }
 0x329   : > { %v1093_v32 = vpop.permute.xlu0 %1092  ;;  %v1003_v43 = vpop.permute.xlu1 %1002 }
 0x32d   : > { %v945_v40 = vpop.permute.xlu0 %944  ;;  %v1035_v45 = vpop.permute.xlu1 %1034 }
 0x32e   : > { %v950_v59 = vsel %vm623_vm4, %v943_v31, %v945_v40  ;;  %v1040_v57 = vsel %vm716_vm7, %v1033_v34, %v1035_v45  ;;  %v1410_v34 = vunpack.c.h.bf16 %v1411_v28  ;;  %v1388_v40 = vld [vmem:[%s2391_s10 + $0x1] ss:$0 sm:$0xff] }
 0x32f   : > { %v954_v62 = vadd.f32 %v950_v59, %v924_v61 }
 0x331   : > { %v975_v48 = vpop.permute.xlu0 %974  ;;  %v1065_v52 = vpop.permute.xlu1 %1064 }
 0x332   : > { %v980_v56 = vsel %vm654_vm5, %v973_v41, %v975_v48  ;;  %v1070_v35 = vsel %vm747_vm8, %v1063_v33, %v1065_v52 }
 0x333   : > { %v984_v23 = vadd.f32 %v980_v56, %v954_v62 }
 0x335   : > { %v1005_v27 = vpop.permute.xlu0 %1004  ;;  %v1095_v1 = vpop.permute.xlu1 %1094 }
 0x336   : > { %v1010_v51 = vsel %vm685_vm6, %v1003_v43, %v1005_v27  ;;  %v1100_v8 = vsel %vm778_vm9, %v1093_v32, %v1095_v1 }
 0x337   : > { %v1014_v10 = vadd.f32 %v1010_v51, %v984_v23 }
 0x339   : > { %v1037_v54 = vpop.permute.xlu0 %1036  ;;  %v947_v58 = vpop.permute.xlu1 %946  ;;  %v1044_v60 = vadd.f32 %v1040_v57, %v1014_v10 }
 0x33b   : > { %v1074_v44 = vadd.f32 %v1070_v35, %v1044_v60 }
 0x33d   : > { %v1067_v38 = vpop.permute.xlu0 %1066  ;;  %v977_v46 = vpop.permute.xlu1 %976  ;;  %v1104_v11 = vadd.f32 %v1100_v8, %v1074_v44 }
 0x341   : > { %v1097_v63 = vpop.permute.xlu0 %1096  ;;  %v1007_v0 = vpop.permute.xlu1 %1006 }
 0x345   : > { %v949_v29 = vpop.permute.xlu0 %948  ;;  %v1125_v2 = vpop.permute.xlu1 %1124 }
 0x346   : > { %v951_v47 = vsel %vm623_vm4, %v947_v58, %v949_v29 }
 0x347   : > { %v955_v25 = vadd.f32 %v951_v47, %v925_v3 }
 0x349   : > { %v979_v37 = vpop.permute.xlu0 %978  ;;  %v1039_v4 = vpop.permute.xlu1 %1038 }
 0x34a   : > { %v981_v42 = vsel %vm654_vm5, %v977_v46, %v979_v37  ;;  %v1041_v9 = vsel %vm716_vm7, %v1037_v54, %v1039_v4 }
 0x34b   : > { %v985_v5 = vadd.f32 %v981_v42, %v955_v25 }
 0x34d   : > { %v1009_v6 = vpop.permute.xlu0 %1008  ;;  %v1069_v36 = vpop.permute.xlu1 %1068 }
 0x34e   : > { %v1011_v53 = vsel %vm685_vm6, %v1007_v0, %v1009_v6  ;;  %v1071_v14 = vsel %vm747_vm8, %v1067_v38, %v1069_v36 }
 0x34f   : > { %v1015_v7 = vadd.f32 %v1011_v53, %v985_v5 }
 0x351   : > { %v1045_v55 = vadd.f32 %v1041_v9, %v1015_v7  ;;  %v1123_v12 = vpop.permute.xlu0 %1122  ;;  %v1099_v13 = vpop.permute.xlu1 %1098 }
 0x352   : > { %v1130_v15 = vsel %vm809_vm10, %v1123_v12, %v1125_v2  ;;  %v1101_v18 = vsel %vm778_vm9, %v1097_v63, %v1099_v13 }
 0x353   : > { %v1075_v16 = vadd.f32 %v1071_v14, %v1045_v55  ;;  %v1134_v17 = vadd.f32 %v1130_v15, %v1104_v11 }
 0x355   : > { %v1141_v19 = vmul.f32 1.442695, %v1134_v17  ;;  %v1105_v20 = vadd.f32 %v1101_v18, %v1075_v16  ;;  %v1127_v21 = vpop.permute.xlu0 %1126  ;;  %v1129_v49 = vpop.permute.xlu1 %1128  ;;  %v1145_v33 = vmul.f32 %v1409_v30, %v1134_v17 }
 0x356   : > { %v1131_v22 = vsel %vm809_vm10, %v1127_v21, %v1129_v49 }
 0x357   : > { %1550 = vpow2.f32 %v1141_v19  ;;  %v1135_v24 = vadd.f32 %v1131_v22, %v1105_v20 }
 0x359   : > { %v1143_v26 = vmul.f32 1.442695, %v1135_v24  ;;  %v1146_v32 = vmul.f32 %v1410_v34, %v1135_v24 }
 0x35b   : > { %1552 = vpow2.f32 %v1143_v26 }
 0x364   : > { %v1551_v31 = vpop.eup %1550 }
 0x365   : > { %v1147_v41 = vsub.f32 %v1551_v31, %v1145_v33 }
 0x367   : > { %v1157_v48 = vmul.f32 %v1388_v40, %v1147_v41 }
 0x368   : > { %v1553_v43 = vpop.eup %1552 }
 0x369   : > { %v1148_v45 = vsub.f32 %v1553_v43, %v1146_v32 }
 0x36b   : > { %v1158_v52 = vmul.f32 %v1388_v40, %v1148_v45 }
 0x36d   : > { %v1159_v27 = vadd.f32 %v1158_v52, %v1157_v48 }
 0x36f   : > { %v1160_v1 = vrot.slane %v1159_v27, 4 }
 0x371   : > { %v1161_v54 = vadd.f32 %v1160_v1, %v1159_v27 }
 0x373   : > { %v1162_v58 = vrot.slane %v1161_v54, 2 }
 0x375   : > { %v1163_v50 = vadd.f32 %v1162_v58, %v1161_v54 }
 0x377   : > { %v1164_v38 = vrot.slane %v1163_v50, 1 }
 0x379   : > { %v1165_v46 = vadd.f32 %v1164_v38, %v1163_v50 }
 0x37b   : > { %1389 = vst [vmem:[%s2394_s17 + $0x1] sm:$0x1] %v1165_v46 }
 0x37c   : > { %1705 = shalt.err (!%p1702_p2)
}
 0x37d   : > { %s1706_s21 = scalar_lea.hbm %s2424_s14, 32  ;;  %s1710_s18 = scalar_lea.hbm %s2475_s7, 64 }
 0x37e   : > { %p1707_p5 = scmp.ne.s32.totalorder %s2424_s14, %s1706_s21  ;;  %p1711_p1 = scmp.lt.s32.totalorder %s2424_s14, %s2475_s7 }
 0x37f   : > { %p1712_p6 = scmp.lt.s32.totalorder %s1710_s18, %s1706_s21 }
 0x380   : > { %p1708_p8 = pnand %p1707_p5, %p2514_p3 }
 0x381   : > { %p1713_p11 = por %p1712_p6, %p1711_p1 }
 0x382   : > { %p1709_p0 = pneg %p1708_p8 }
 0x384   : > { %p1714_p7 = pnand %p1713_p11, %p1709_p0 }
 0x386   : > { %1717 = shalt.err (!%p1714_p7)
}
 0x387   : > { %s1796_s26 = smov 16   ;;  %s1797_s4 = smov 1  }
 0x388   : > { %1432 = dma.vmem_to_hbm [thread:$0]  (%p2514_p3), %s2419_s19, 32, %s2424_s14, %s1169_s1, %s1796_s26, %s1796_s26, %s1797_s4  }
 0x389 PF: > { %s2515_s10 = sld [smem:[#allocation19_spill]]  ;;  %s1197_s17 = sand.u32 1, %s1752_s24  }
 0x38a   : > { %p2517_p10 = scmp.ge.s32.totalorder %s1764_s27, 2  ;;  %s1198_s11 = scalar_lea.sflag [#allocation4], %s1197_s17 }
 0x38f   : > { %p2516_p9 = scmp.ne.s32.totalorder %s2515_s10, 0 }
 0x391   : > { %p1452_p4 = pnand %p2517_p10, %p2516_p9 }
 0x393   : > { %p1453_p12 = pneg %p1452_p4 }
 0x395   : > { %1747 = dma.done.wait (%p1453_p12), %s1198_s11, 32  }
 0x396   : > { %1749 = vsyncadd (%p1453_p12), %s1198_s11, 4294967264  ;;  %s2518_s27 = sld [smem:[#allocation17_spill]]  ;;  %s2521_s24 = smov %s1756_s25 }
 0x397   : > { %s2519_s22 = sld [smem:[#allocation16_spill]] }
 0x398   : > { %s2520_s26 = sld [smem:[#allocation18_spill]] }
 0x39c   : > { %p24_p13 = scmp.ge.s32.totalorder %s2518_s27, 4  }
 0x39d   : > { %s2522_s25 = smov %s2519_s22 }
 0x39e   :  { %26 = sbr.rel (!%p24_p13) target bundleno = 11 (0xb), region = 141 }
 0x3a3   :  { %1203 = vsyncpa [#allocation3], 1 }
 0x3a4   :  { %1205 = vsyncpa [#allocation3 + $0x1], 1 }
 0x3a5   :  { %1206 = vsyncpa [#allocation6], 1 }
 0x3a6   :  { %1208 = vsyncpa [#allocation6 + $0x1], 1 }
 0x3a7   :  { %1209 = vsyncpa [#allocation9], 1 }
 0x3a8   :  { %1211 = vsyncpa [#allocation9 + $0x1], 1 }
 0x3a9   :  { %1212 = vsyncpa [#allocation4], 1 }
 0x3aa   :  { %1214 = vsyncpa [#allocation4 + $0x1], 1 }

</bundles_post_ra>
